<compile_context>
chip_gen: v6e
topology: v6e:2x2x1
jax: 0.10.0
libtpu: 0.0.40
codegen_flags: <defaults>
</compile_context>

<pallas_src>
import math
import jax
import jax.numpy as jnp
from jax.experimental import pallas as pl
from jax.experimental.pallas import tpu as pltpu


def _round_up(x, m):
    return ((x + m - 1) // m) * m


def _mlp_kernel(x_ref, w1_ref, b1_ref, w2_ref, b2_ref, o_ref):
    # x_ref:  (TM, F) bf16   w1_ref: (F, H) bf16   b1_ref: (1, H) f32
    # w2_ref: (H, F) bf16    b2_ref: (1, F) f32    o_ref:  (TM, F) out dtype
    x = x_ref[...]
    # fc1 (bf16 operands, f32 accumulation) + bias in f32
    h = jnp.dot(x, w1_ref[...], preferred_element_type=jnp.float32) + b1_ref[...]
    # Exact (erf-based) GELU in f32, matching torch.nn.functional.gelu default.
    h = 0.5 * h * (1.0 + jax.lax.erf(h * (1.0 / math.sqrt(2.0))))
    # dropout1: identity in eval mode
    # fc2 (feed bf16 into the MXU, accumulate f32) + bias in f32
    y = jnp.dot(h.astype(w2_ref.dtype), w2_ref[...],
                preferred_element_type=jnp.float32) + b2_ref[...]
    # dropout2: identity in eval mode
    o_ref[...] = y.astype(o_ref.dtype)


def mlp_forward(x, w1, b1, w2, b2, *, tile_m=512, compute_dtype=jnp.bfloat16):
    """x: [B, S, F]; w1: [F, H]; b1: [H]; w2: [H, F]; b2: [F]."""
    B, S, F = x.shape
    H = w1.shape[1]
    M = B * S
    out_dtype = x.dtype

    # Tile size over tokens: multiple of 8 sublanes, capped by tile_m.
    TM = tile_m if M >= tile_m else _round_up(M, 8)
    M_pad = _round_up(M, TM)
    grid_m = M_pad // TM

    x2d = x.reshape(M, F)
    if M_pad != M:
        x2d = jnp.pad(x2d, ((0, M_pad - M), (0, 0)))

    # Matmul operands in compute_dtype (bf16); biases stay f32 for the f32 epilogue.
    x2d_c = x2d.astype(compute_dtype)
    w1_c = w1.astype(compute_dtype)
    w2_c = w2.astype(compute_dtype)
    b1_2d = b1.reshape(1, H).astype(jnp.float32)
    b2_2d = b2.reshape(1, F).astype(jnp.float32)

    itemsize_c = jnp.dtype(compute_dtype).itemsize
    itemsize_o = jnp.dtype(out_dtype).itemsize

    # VMEM budget: resident weights + double-buffered x/out tiles + f32 intermediates.
    w_bytes = (F * H + H * F) * itemsize_c + (H + F) * 4
    xo_bytes = 2 * (TM * F * itemsize_c + TM * F * itemsize_o)   # 2x double buffering
    inter_bytes = 3 * TM * H * 4                                  # (TM,H) f32 temporaries
    vmem_limit = int(1.5 * (w_bytes + xo_bytes + inter_bytes)) + (4 << 20)
    vmem_limit = max(16 << 20, min(vmem_limit, 64 << 20))         # stay within v7x physical

    cost = pl.CostEstimate(
        flops=2 * M_pad * F * H + 2 * M_pad * H * F,
        transcendentals=M_pad * H,
        bytes_accessed=(M_pad * F * (itemsize_c + itemsize_o)
                        + (F * H + H * F) * itemsize_c + (H + F) * 4),
    )

    out = pl.pallas_call(
        _mlp_kernel,
        out_shape=jax.ShapeDtypeStruct((M_pad, F), out_dtype),
        grid_spec=pltpu.PrefetchScalarGridSpec(
            num_scalar_prefetch=0,
            grid=(grid_m,),
            in_specs=[
                pl.BlockSpec((TM, F), lambda i: (i, 0)),   # x tile streams with grid
                pl.BlockSpec((F, H), lambda i: (0, 0)),    # w1 resident
                pl.BlockSpec((1, H), lambda i: (0, 0)),    # b1 resident
                pl.BlockSpec((H, F), lambda i: (0, 0)),    # w2 resident
                pl.BlockSpec((1, F), lambda i: (0, 0)),    # b2 resident
            ],
            out_specs=pl.BlockSpec((TM, F), lambda i: (i, 0)),
        ),
        compiler_params=pltpu.CompilerParams(
            dimension_semantics=("parallel",),
            vmem_limit_bytes=vmem_limit,
        ),
        cost_estimate=cost,
    )(x2d_c, w1_c, b1_2d, w2_c, b2_2d)

    return out[:M].reshape(B, S, F)
    # TODO(synk): for production F/H too large for resident bf16 weights (e.g. F>=4096),
    # add an H-tiling grid axis with a (TM,F) f32 accumulator (init/finalize via pl.when).


def init_mlp_params(key, num_features, expansion_factor, dtype=jnp.float32):
    """Deterministic init mimicking nn.Linear (uniform(-1/sqrt(fan_in), 1/sqrt(fan_in)))."""
    num_hidden = num_features * expansion_factor
    k1, k2, k3, k4 = jax.random.split(key, 4)
    bound1 = 1.0 / math.sqrt(num_features)
    bound2 = 1.0 / math.sqrt(num_hidden)
    # Stored already transposed to (in, out) so the kernel does x @ W.
    w1 = jax.random.uniform(k1, (num_features, num_hidden), dtype, -bound1, bound1)
    b1 = jax.random.uniform(k2, (num_hidden,), dtype, -bound1, bound1)
    w2 = jax.random.uniform(k3, (num_hidden, num_features), dtype, -bound2, bound2)
    b2 = jax.random.uniform(k4, (num_features,), dtype, -bound2, bound2)
    return w1, b1, w2, b2


if __name__ == "__main__":
    key = jax.random.PRNGKey(0)
    kx, kp = jax.random.split(key)

    # Small but lane-dense shapes: F and H are multiples of 128; tile_m=128 gives
    # a 2-step grid so the M-tiling / pipelining path is actually exercised.
    B, S = 2, 128
    num_features = 128
    expansion_factor = 4  # hidden = 512

    x = jax.random.normal(kx, (B, S, num_features), jnp.float32)
    w1, b1, w2, b2 = init_mlp_params(kp, num_features, expansion_factor)

    out = mlp_forward(x, w1, b1, w2, b2, tile_m=128)
    out = jax.block_until_ready(out)

    # Reference in plain JAX, emulating the kernel's bf16-operand / f32-accumulate
    # matmuls (exact-erf GELU, dropout = identity in eval mode).
    bf = jnp.bfloat16
    x2 = x.reshape(-1, num_features).astype(bf).astype(jnp.float32)
    w1f = w1.astype(bf).astype(jnp.float32)
    w2f = w2.astype(bf).astype(jnp.float32)
    h_ref = jax.nn.gelu(x2 @ w1f + b1, approximate=False)
    ref = (h_ref.astype(bf).astype(jnp.float32) @ w2f + b2).reshape(B, S, num_features)
    assert jnp.allclose(out, ref, atol=2e-2, rtol=2e-2), (
        float(jnp.max(jnp.abs(out - ref))))

    print("KERNEL_OK")
</pallas_src>

<mosaic_0001>
module attributes {stable_mosaic.version = 11 : i64} {
  func.func @_mlp_kernel(%arg0: i32, %arg1: memref<128x128xbf16, #tpu.memory_space<vmem>>, %arg2: memref<128x512xbf16, #tpu.memory_space<vmem>>, %arg3: memref<1x512xf32, #tpu.memory_space<vmem>>, %arg4: memref<512x128xbf16, #tpu.memory_space<vmem>>, %arg5: memref<1x128xf32, #tpu.memory_space<vmem>>, %arg6: memref<128x128xf32, #tpu.memory_space<vmem>>) attributes {dimension_semantics = [#tpu.dimension_semantics<parallel>], iteration_bounds = array<i64: 2>, scalar_prefetch = 0 : i64, scratch_operands = 0 : i64, tpu.core_type = #tpu.core_type<tc>, window_params = [{transform_indices = @transform_0, window_bounds = array<i64: 128, 128>}, {pipeline_mode = #tpu.pipeline_mode<synchronous>, transform_indices = @transform_1, window_bounds = array<i64: 128, 512>}, {pipeline_mode = #tpu.pipeline_mode<synchronous>, transform_indices = @transform_2, window_bounds = array<i64: 1, 512>}, {pipeline_mode = #tpu.pipeline_mode<synchronous>, transform_indices = @transform_3, window_bounds = array<i64: 512, 128>}, {pipeline_mode = #tpu.pipeline_mode<synchronous>, transform_indices = @transform_4, window_bounds = array<i64: 1, 128>}, {transform_indices = @transform_5, window_bounds = array<i64: 128, 128>}]} {
    %c0 = arith.constant 0 : index
    %c0_0 = arith.constant 0 : index
    %0 = vector.load %arg1[%c0, %c0_0] : memref<128x128xbf16, #tpu.memory_space<vmem>>, vector<128x128xbf16>
    %c0_1 = arith.constant 0 : index
    %c0_2 = arith.constant 0 : index
    %1 = vector.load %arg2[%c0_1, %c0_2] : memref<128x512xbf16, #tpu.memory_space<vmem>>, vector<128x512xbf16>
    %cst = arith.constant dense<0.000000e+00> : vector<128x512xf32>
    %2 = tpu.matmul %0, %1, %cst {dimension_numbers = #tpu.dot_dimension_numbers<[1], [0], [0], [1], [0, 0, 1, 1], [], []>} : vector<128x128xbf16>, vector<128x512xbf16>, vector<128x512xf32> -> vector<128x512xf32>
    %c0_3 = arith.constant 0 : index
    %c0_4 = arith.constant 0 : index
    %3 = vector.load %arg3[%c0_3, %c0_4] : memref<1x512xf32, #tpu.memory_space<vmem>>, vector<1x512xf32>
    %4 = vector.broadcast %3 : vector<1x512xf32> to vector<128x512xf32>
    %5 = arith.addf %2, %4 : vector<128x512xf32>
    %cst_5 = arith.constant 5.000000e-01 : f32
    %6 = vector.broadcast %cst_5 : f32 to vector<128x512xf32>
    %7 = arith.mulf %6, %5 : vector<128x512xf32>
    %cst_6 = arith.constant 0.707106769 : f32
    %8 = vector.broadcast %cst_6 : f32 to vector<128x512xf32>
    %9 = arith.mulf %5, %8 : vector<128x512xf32>
    %10 = math.erf %9 : vector<128x512xf32>
    %cst_7 = arith.constant 1.000000e+00 : f32
    %11 = vector.broadcast %cst_7 : f32 to vector<128x512xf32>
    %12 = arith.addf %11, %10 : vector<128x512xf32>
    %13 = arith.mulf %7, %12 : vector<128x512xf32>
    %14 = arith.truncf %13 : vector<128x512xf32> to vector<128x512xbf16>
    %c0_8 = arith.constant 0 : index
    %c0_9 = arith.constant 0 : index
    %15 = vector.load %arg4[%c0_8, %c0_9] : memref<512x128xbf16, #tpu.memory_space<vmem>>, vector<512x128xbf16>
    %cst_10 = arith.constant dense<0.000000e+00> : vector<128x128xf32>
    %16 = tpu.matmul %14, %15, %cst_10 {dimension_numbers = #tpu.dot_dimension_numbers<[1], [0], [0], [1], [0, 0, 1, 1], [], []>} : vector<128x512xbf16>, vector<512x128xbf16>, vector<128x128xf32> -> vector<128x128xf32>
    %c0_11 = arith.constant 0 : index
    %c0_12 = arith.constant 0 : index
    %17 = vector.load %arg5[%c0_11, %c0_12] : memref<1x128xf32, #tpu.memory_space<vmem>>, vector<1x128xf32>
    %18 = vector.broadcast %17 : vector<1x128xf32> to vector<128x128xf32>
    %19 = arith.addf %16, %18 : vector<128x128xf32>
    %c0_13 = arith.constant 0 : index
    %c0_14 = arith.constant 0 : index
    %20 = vector.load %arg6[%c0_13, %c0_14] : memref<128x128xf32, #tpu.memory_space<vmem>>, vector<128x128xf32>
    tpu.vector_store %arg6[%c0_13, %c0_14], %19 {strides = array<i32>} : memref<128x128xf32, #tpu.memory_space<vmem>>, vector<128x128xf32>,
    return
  }
  func.func @transform_0(%arg0: i32) -> (i32, i32) {
    %c0_i32 = arith.constant 0 : i32
    %c0_i32_0 = arith.constant 0 : i32
    return %arg0, %c0_i32 : i32, i32
  }
  func.func @transform_1(%arg0: i32) -> (i32, i32) {
    %c0_i32 = arith.constant 0 : i32
    %c0_i32_0 = arith.constant 0 : i32
    %c0_i32_1 = arith.constant 0 : i32
    return %c0_i32, %c0_i32_0 : i32, i32
  }
  func.func @transform_2(%arg0: i32) -> (i32, i32) {
    %c0_i32 = arith.constant 0 : i32
    %c0_i32_0 = arith.constant 0 : i32
    %c0_i32_1 = arith.constant 0 : i32
    return %c0_i32, %c0_i32_0 : i32, i32
  }
  func.func @transform_3(%arg0: i32) -> (i32, i32) {
    %c0_i32 = arith.constant 0 : i32
    %c0_i32_0 = arith.constant 0 : i32
    %c0_i32_1 = arith.constant 0 : i32
    return %c0_i32, %c0_i32_0 : i32, i32
  }
  func.func @transform_4(%arg0: i32) -> (i32, i32) {
    %c0_i32 = arith.constant 0 : i32
    %c0_i32_0 = arith.constant 0 : i32
    %c0_i32_1 = arith.constant 0 : i32
    return %c0_i32, %c0_i32_0 : i32, i32
  }
  func.func @transform_5(%arg0: i32) -> (i32, i32) {
    %c0_i32 = arith.constant 0 : i32
    %c0_i32_0 = arith.constant 0 : i32
    return %arg0, %c0_i32 : i32, i32
  }
}

</mosaic_0001>

<bundles_post_ra>
// kernel: tpu_custom_call.1
= control target key start
LH: loop header
LB: loop body
LE: loop exit
PB: predicated region body
PF: predicated region fallthrough
CT: control target
= control target key end

     0   :  { %10 = vsyncpa [#allocation3], 0  ;;  %s3227_s0 = inlined_call_operand.hbm [shape: bf16[256,128], index: 0, kind: input, shape index: {}]   ;;  %s3228_s1 = inlined_call_operand.hbm [shape: bf16[128,512], index: 1, kind: input, shape index: {}]   ;;  %s3229_s2 = inlined_call_operand.hbm [shape: f32[1,512], index: 2, kind: input, shape index: {}]   ;;  %s3230_s3 = inlined_call_operand.hbm [shape: bf16[512,128], index: 3, kind: input, shape index: {}]   ;;  %s3231_s4 = inlined_call_operand.vmem [shape: f32[1,128], index: 4, kind: input, shape index: {}]   ;;  %s3232_s5 = inlined_call_operand.hbm [shape: f32[256,128], index: 5, kind: output, shape index: {}]  }
   0x1   :  { %12 = vsyncpa [#allocation3 + $0x1], 0 }
   0x2   :  { %13 = vsyncpa [#allocation6], 0 }
   0x3   :  { %14 = vsyncpa [#allocation9], 0 }
   0x4   :  { %15 = vsyncpa [#allocation4], 0 }
   0x5   :  { %17 = vsyncpa [#allocation4 + $0x1], 0  ;;  %s2478_s18 = smov 0   ;;  %s2480_s19 = smov 0  }
   0x6   :  { %s2482_s20 = smov 0   ;;  %s2484_s21 = smov 0  }
   0x7 LB: > { %s2499_s22 = sadd.s32 4294967295, %s2434_s21   ;;  %s1733_s23 = sadd.s32 4294967294, %s2434_s21   ;;  %s2434_s21 = sphi %s2484_s21, %s3258_s21   ;;  %s2430_s20 = sphi %s2482_s20, %s3257_s20   ;;  %s2426_s19 = sphi %s2480_s19, %s3256_s19   ;;  %s2422_s18 = sphi %s2478_s18, %s3255_s18  }
   0x8   : > { %p43_p0 = scmp.ne.s32.totalorder %s2426_s19, %s2422_s18  ;;  %p3233_p1 = scmp.eq.s32.totalorder %s2499_s22, 0 }
   0x9   : > { %p157_p3 = scmp.eq.s32.totalorder %s1733_s23, 1  ;;  %p1734_p5 = scmp.ge.s32.totalorder %s2434_s21, 1 }
   0xa   : > { %p2508_p4 = por %p3233_p1, %p43_p0  ;;  %p164_p7 = scmp.lt.s32.totalorder %s2434_s21, 3 }
   0xb   : > { %p2513_p6 = por %p157_p3, %p43_p0  ;;  %s2436_s27 = smov [#allocation5]  }
   0xc   : > { %s3238_s24 = scalar_select %p2508_p4, 1, 0 }
   0xd   : > { %s3239_s25 = scalar_select %p2513_p6, 1, 0 }
   0xe   : > { %p2518_p8 = pnand %p1734_p5, %p164_p7  ;;  %s176_s28 = sshll.u32 %s2436_s27, 4  ;;  %s177_s28 = int_to_ptr.vmem [resolvable:$true] %s176_s28 }
   0xf   : > { %s2437_s30 = smov [#allocation7]   ;;  %s2438_s7 = smov [#allocation8]  }
  0x10   : > { %s3240_s26 = scalar_select %p2518_p8, 1, 0 }
  0x11   : > { %p1972_p9 = pneg %p2518_p8  ;;  %s190_s6 = sshll.u32 %s2437_s30, 4  ;;  %s191_s6 = int_to_ptr.vmem [resolvable:$true] %s190_s6 }
  0x12   : > { %s200_s8 = sshll.u32 %s2438_s7, 4  ;;  %s2267_s9 = scalar_lea.vmem %s177_s28, 4096  ;;  %s201_s8 = int_to_ptr.vmem [resolvable:$true] %s200_s8 }
  0x13   : > { %p2527_p11 = pnand %p1972_p9, %p3233_p1  ;;  %p2268_p13 = scmp.ne.s32.totalorder %s177_s28, %s2267_s9 }
  0x14   : > { %p2275_p5 = scmp.lt.s32.totalorder %s177_s28, %s177_s28  ;;  %p2276_p7 = scmp.lt.s32.totalorder %s2267_s9, %s2267_s9 }
  0x15   : > { %p2258_p12 = pneg %p2527_p11 }
  0x16   : > { %p2277_p9 = por %p2276_p7, %p2275_p5 }
  0x17   : > { %p2270_p0 = pnand %p2268_p13, %p2258_p12 }
  0x19   : > { %p2271_p3 = pneg %p2270_p0 }
  0x1b   : > { %p2278_p10 = pnand %p2277_p9, %p2271_p3 }
  0x1d   : > { %2281 = shalt.err (!%p2278_p10)
}
  0x1e   : > { %s2439_s10 = smov 256   ;;  %s2440_s11 = smov 16  }
  0x1f   : > { %1975 = dma.hbm_to_vmem [thread:$0]  (!%p2527_p11), %s3228_s1, 4096, %s177_s28, [#allocation6], %s2439_s10, %s2439_s10, %s2440_s11  }
  0x20   : > { %s2293_s14 = scalar_lea.vmem %s191_s6, 64  ;;  %p2301_p2 = scmp.lt.s32.totalorder %s191_s6, %s191_s6 }
  0x21   : > { %p2294_p1 = scmp.ne.s32.totalorder %s191_s6, %s2293_s14  ;;  %p2302_p6 = scmp.lt.s32.totalorder %s2293_s14, %s2293_s14 }
  0x23   : > { %p2296_p13 = pnand %p2294_p1, %p2258_p12  ;;  %p2303_p5 = por %p2302_p6, %p2301_p2 }
  0x25   : > { %p2297_p0 = pneg %p2296_p13 }
  0x27   : > { %p2304_p3 = pnand %p2303_p5, %p2297_p0 }
  0x29   : > { %2307 = shalt.err (!%p2304_p3)
}
  0x2a   : > { %1978 = dma.hbm_to_vmem [thread:$0]  (!%p2527_p11), %s3229_s2, 64, %s191_s6, [#allocation6]  }
  0x2b   : > { %s2319_s17 = scalar_lea.vmem %s201_s8, 4096  ;;  %p2327_p9 = scmp.lt.s32.totalorder %s201_s8, %s201_s8 }
  0x2c   : > { %p2320_p10 = scmp.ne.s32.totalorder %s201_s8, %s2319_s17  ;;  %p2328_p13 = scmp.lt.s32.totalorder %s2319_s17, %s2319_s17 }
  0x2e   : > { %p2322_p7 = pnand %p2320_p10, %p2258_p12  ;;  %p2329_p4 = por %p2328_p13, %p2327_p9 }
  0x30   : > { %p2323_p1 = pneg %p2322_p7 }
  0x32   : > { %p2330_p2 = pnand %p2329_p4, %p2323_p1 }
  0x34   : > { %2333 = shalt.err (!%p2330_p2)
}
  0x35   : > { %s3235_s23 = smov 64   ;;  %s2442_s27 = smov 4  }
  0x36   : > { %1981 = dma.hbm_to_vmem [thread:$0]  (!%p2527_p11), %s3230_s3, 4096, %s201_s8, [#allocation9], %s3235_s23, %s3235_s23, %s2442_s27  }
  0x37   : > { %s2561_s6 = sadd.s32 1, %s2434_s21   ;;  %s30_s9 = sadd.s32 1, %s2430_s20 }
  0x38   : > { %s27_s7 = ssub.s32 %s2434_s21, %s2561_s6  ;;  %p37_p6 = scmp.ne.s32.totalorder %s2430_s20, %s2426_s19 }
  0x39   : > { %p28_p4 = scmp.eq.s32.totalorder %s27_s7, 0  ;;  %p38_p12 = scmp.eq.s32.totalorder %s2434_s21, 0 }
  0x3a   : > { %p1993_p0 = scmp.lt.s32.totalorder %s2434_s21, 2  ;;  %p3242_p3 = scmp.eq.s32.totalorder %s2499_s22, 1 }
  0x3b   : > { %s2571_s10 = scalar_select %p28_p4, %s2430_s20, %s30_s9  }
  0x3c   : > { %p39_p5 = por %p38_p12, %p37_p6  ;;  %p2575_p10 = por %p3242_p3, %p37_p6 }
  0x3d   : > { %s217_s11 = sand.u32 1, %s2430_s20   ;;  %s1826_s12 = sshll.u32 %s2434_s21, 10 }
  0x3e   : > { %s3243_s29 = scalar_select %p2575_p10, 1, 0 }
  0x3f   : > { %s1739_s8 = sshll.u32 %s217_s11, 6  ;;  %s2584_s15 = scalar_lea.hbm %s3227_s0, %s1826_s12 }
  0x40   : > { %s221_s16 = scalar_lea.vmem [#allocation2], %s1739_s8  ;;  %p2586_p11 = pnand %p1993_p0, %p39_p5 }
  0x41   : > { %s228_s17 = sshll.u32 %s221_s16, 4  ;;  %s2592_s30 = scalar_lea.sflag [#allocation3], %s217_s11  ;;  %s2590_s17 = int_to_ptr.vmem [resolvable:$true] %s228_s17 }
  0x42   : > { %s2334_s7 = scalar_lea.hbm %s2584_s15, 1024  ;;  %p2336_p1 = pneg %p2586_p11 }
  0x43   : > { %p2335_p7 = scmp.ne.s32.totalorder %s2584_s15, %s2334_s7  ;;  %s2339_s8 = scalar_lea.hbm %s3227_s0, 2048 }
  0x44   : > { %p2340_p2 = scmp.lt.s32.totalorder %s2584_s15, %s3227_s0  ;;  %p2341_p4 = scmp.lt.s32.totalorder %s2339_s8, %s2334_s7 }
  0x45   : > { %p2337_p9 = pnand %p2336_p1, %p2335_p7 }
  0x46   : > { %p2342_p6 = por %p2341_p4, %p2340_p2 }
  0x47   : > { %p2338_p13 = pneg %p2337_p9 }
  0x49   : > { %p2343_p12 = pnand %p2342_p6, %p2338_p13 }
  0x4b   : > { %2346 = shalt.err (!%p2343_p12)
}
  0x4c   : > { %s2347_s11 = scalar_lea.vmem %s2590_s17, 1024  ;;  %s2443_s16 = smov [#allocation2]  }
  0x4d   : > { %p2348_p0 = scmp.ne.s32.totalorder %s2590_s17, %s2347_s11  ;;  %s2352_s23 = sshll.u32 %s2443_s16, 4  ;;  %s2353_s23 = int_to_ptr.vmem [resolvable:$false] %s2352_s23 }
  0x4e   : > { %s2354_s9 = scalar_lea.vmem %s2353_s23, 2048  ;;  %p2355_p7 = scmp.lt.s32.totalorder %s2590_s17, %s2353_s23 }
  0x4f   : > { %p2350_p5 = pnand %p2348_p0, %p2336_p1  ;;  %p2356_p9 = scmp.lt.s32.totalorder %s2354_s9, %s2347_s11 }
  0x51   : > { %p2351_p3 = pneg %p2350_p5  ;;  %p2357_p10 = por %p2356_p9, %p2355_p7 }
  0x53   : > { %p2358_p8 = pnand %p2357_p10, %p2351_p3 }
  0x55   : > { %2361 = shalt.err (!%p2358_p8)
}
  0x56   : > { %s3245_s7 = smov 64   ;;  %p3246_p1 = scmp.ne.s32.totalorder %s3240_s26, 0 }
  0x57   : > { %1985 = dma.hbm_to_vmem [thread:$0]  (!%p2586_p11), %s2584_s15, 1024, %s2590_s17, %s2592_s30, %s3245_s7, %s3245_s7, %s2442_s27  }
  0x58   : > { %240 = sbr.rel (%p3246_p1) target bundleno = 664 (0x298), region = 40  ;;  %s2619_s12 = sand.u32 (!%p3246_p1), 1, %s2426_s19  }
  0x59   : > { %s1743_s23 = sshll.u32 (!%p3246_p1), %s2619_s12, 6  ;;  %s243_s8 = scalar_lea.sflag (!%p3246_p1), [#allocation3], %s2619_s12 }
  0x5a   : > { %s2623_s13 = scalar_lea.vmem (!%p3246_p1), [#allocation2], %s1743_s23  ;;  %p3247_p8 = scmp.ne.s32.totalorder (!%p3246_p1), %s3238_s24, 0 }
  0x5d   : > { %2405 = dma.done.wait (%p3247_p8), %s243_s8, 1024  }
  0x5e   : > { %2407 = vsyncadd (%p3247_p8), %s243_s8, 4294966272  ;;  %p3248_p10 = scmp.eq.s32.totalorder %s2499_s22, 0 }
  0x60   : > { %2409 = dma.done.wait (%p3248_p10), [#allocation6], 4160   ;;  %p3249_p11 = pmov %p3248_p10 }
  0x61   : > { %p3250_p13 = pmov %p3248_p10 }
  0x62   : > { %2411 = vsyncadd (%p3249_p11), [#allocation6], 4294963136 }
  0x63   : > { %2413 = dma.done.wait (%p3250_p13), [#allocation9], 4096   ;;  %p3251_p2 = pmov %p3248_p10 }
  0x64   : > { %v2444_v0 = vmov 0   ;;  %v2040_v1 = vld [vmem:[#allocation5 + $0xe4] ss:$16 sps:$4 sm:$0xff]   ;;  %v2042_v2 = vld [vmem:[#allocation5 + $0xec] ss:$16 sps:$4 sm:$0xff]   ;;  %s1747_s27 = sshll.u32 %s2619_s12, 7 }
  0x65   : > { %2415 = vsyncadd (%p3251_p2), [#allocation9], 4294963200  ;;  %598 = vmatprep.mubr.bf16.mxu0 %v2444_v0  ;;  %711 = vmatprep.mubr.bf16.mxu1 %v2444_v0  ;;  %v2044_v3 = vld [vmem:[#allocation5 + $0xe0] ss:$16 sps:$4 sm:$0xff]   ;;  %v2045_v4 = vld [vmem:[#allocation5 + $0xe8] ss:$16 sps:$4 sm:$0xff]  }
  0x66   : > { %566 = vmatprep.subr.bf16.mxu0 %v2040_v1  ;;  %679 = vmatprep.subr.bf16.mxu1 %v2042_v2  ;;  %v2046_v5 = vld [vmem:[#allocation5 + $0xc4] ss:$16 sps:$4 sm:$0xff]   ;;  %v2048_v6 = vld [vmem:[#allocation5 + $0xcc] ss:$16 sps:$4 sm:$0xff]   ;;  %v2050_v7 = vld [vmem:[#allocation5 + $0xc0] ss:$16 sps:$4 sm:$0xff]  }
  0x67   : > { %567 = vmatpush1.bf16.msra.mxu0 %v2044_v3  ;;  %680 = vmatpush1.bf16.msra.mxu1 %v2045_v4  ;;  %v2051_v8 = vld [vmem:[#allocation5 + $0xc8] ss:$16 sps:$4 sm:$0xff]   ;;  %v2052_v9 = vld [vmem:[#allocation5 + $0xa4] ss:$16 sps:$4 sm:$0xff]   ;;  %v2054_v10 = vld [vmem:[#allocation5 + $0xac] ss:$16 sps:$4 sm:$0xff]  }
  0x68   : > { %568 = vmatprep.subr.bf16.mxu0 %v2046_v5  ;;  %681 = vmatprep.subr.bf16.mxu1 %v2048_v6  ;;  %v2056_v11 = vld [vmem:[#allocation5 + $0xa0] ss:$16 sps:$4 sm:$0xff]   ;;  %v2057_v12 = vld [vmem:[#allocation5 + $0xa8] ss:$16 sps:$4 sm:$0xff]   ;;  %v2058_v13 = vld [vmem:[#allocation5 + $0x84] ss:$16 sps:$4 sm:$0xff]  }
  0x69   : > { %v2060_v14 = vld [vmem:[#allocation5 + $0x8c] ss:$16 sps:$4 sm:$0xff]   ;;  %v2062_v15 = vld [vmem:[#allocation5 + $0x80] ss:$16 sps:$4 sm:$0xff]   ;;  %v2063_v16 = vld [vmem:[#allocation5 + $0x88] ss:$16 sps:$4 sm:$0xff]  }
  0x6a   : > { %v2064_v17 = vld [vmem:[#allocation5 + $0x64] ss:$16 sps:$4 sm:$0xff]   ;;  %v2066_v18 = vld [vmem:[#allocation5 + $0x6c] ss:$16 sps:$4 sm:$0xff]   ;;  %v2068_v19 = vld [vmem:[#allocation5 + $0x60] ss:$16 sps:$4 sm:$0xff]  }
  0x6b   : > { %569 = vmatpush1.bf16.msra.mxu0 %v2050_v7  ;;  %682 = vmatpush1.bf16.msra.mxu1 %v2051_v8  ;;  %v2069_v20 = vld [vmem:[#allocation5 + $0x68] ss:$16 sps:$4 sm:$0xff]   ;;  %v2070_v21 = vld [vmem:[#allocation5 + $0x44] ss:$16 sps:$4 sm:$0xff]   ;;  %v2072_v22 = vld [vmem:[#allocation5 + $0x4c] ss:$16 sps:$4 sm:$0xff]  }
  0x6c   : > { %570 = vmatprep.subr.bf16.mxu0 %v2052_v9  ;;  %683 = vmatprep.subr.bf16.mxu1 %v2054_v10  ;;  %v2074_v23 = vld [vmem:[#allocation5 + $0x40] ss:$16 sps:$4 sm:$0xff]   ;;  %v2075_v24 = vld [vmem:[#allocation5 + $0x48] ss:$16 sps:$4 sm:$0xff]   ;;  %v2076_v25 = vld [vmem:[#allocation5 + $0x24] ss:$16 sps:$4 sm:$0xff]   ;;  %v338_v9 = vlaneseq }
  0x6d   : > { %v2078_v26 = vld [vmem:[#allocation5 + $0x2c] ss:$16 sps:$4 sm:$0xff]   ;;  %v2080_v27 = vld [vmem:[#allocation5 + $0x20] ss:$16 sps:$4 sm:$0xff]   ;;  %v2081_v28 = vld [vmem:[#allocation5 + $0x28] ss:$16 sps:$4 sm:$0xff]  }
  0x6e   : > { %v2082_v29 = vld [vmem:[#allocation5 + $0x4] ss:$16 sps:$4 sm:$0xff]   ;;  %v2084_v30 = vld [vmem:[#allocation5 + $0xc] ss:$16 sps:$4 sm:$0xff]   ;;  %v2086_v31 = vld [vmem:[#allocation5] ss:$16 sps:$4 sm:$0xff]  }
  0x6f   : > { %571 = vmatpush1.bf16.msra.mxu0 %v2056_v11  ;;  %684 = vmatpush1.bf16.msra.mxu1 %v2057_v12  ;;  %v2087_v32 = vld [vmem:[#allocation5 + $0x8] ss:$16 sps:$4 sm:$0xff]   ;;  %v2088_v33 = vld [vmem:[%s2623_s13] sm:$0xff]   ;;  %v2104_v43 = vld [vmem:[#allocation8 + $0x68] sm:$0xff]   ;;  %v339_v10 = vshrl.u32 %v338_v9, 7  ;;  %s3144_s15 = scalar_lea.vmem [#allocation10], %s1747_s27 }
  0x70   : > { %572 = vmatprep.subr.bf16.mxu0 %v2058_v13  ;;  %685 = vmatprep.subr.bf16.mxu1 %v2060_v14  ;;  %v2096_v34 = vld [vmem:[#allocation8 + $0x78] sm:$0xff]   ;;  %v2100_v38 = vld [vmem:[#allocation8 + $0x70] sm:$0xff]   ;;  %v2089_v41 = vld [vmem:[%s2623_s13 + $0x8] sm:$0xff]   ;;  %s1827_s17 = sshll.u32 %s2499_s22, 11  ;;  %s1631_s28 = sshll.u32 %s3144_s15, 4  ;;  %s3183_s28 = int_to_ptr.vmem [resolvable:$true] %s1631_s28 }
  0x71   : > { %v2097_v35 = vld [vmem:[#allocation8 + $0x38] sm:$0xff]   ;;  %v2101_v39 = vld [vmem:[#allocation8 + $0x30] sm:$0xff]   ;;  %v2105_v44 = vld [vmem:[#allocation8 + $0x28] sm:$0xff]   ;;  %v340_v11 = vsub.s32 0, %v339_v10  ;;  %v348_v13 = vsub.s32 2, %v339_v10  ;;  %v344_v14 = vsub.s32 1, %v339_v10  ;;  %s3181_s11 = scalar_lea.hbm %s3232_s5, %s1827_s17 }
  0x72   : > { %v2098_v36 = vld [vmem:[#allocation8 + $0xf8] sm:$0xff]   ;;  %v2102_v40 = vld [vmem:[#allocation8 + $0xf0] sm:$0xff]   ;;  %v2106_v45 = vld [vmem:[#allocation8 + $0xe8] sm:$0xff]   ;;  %s1618_s16 = scalar_lea.sflag [#allocation4], %s2619_s12  ;;  %s2362_s9 = scalar_lea.vmem %s3183_s28, 2048 }
  0x73   : > { %573 = vmatpush1.bf16.msra.mxu0 %v2062_v15  ;;  %686 = vmatpush1.bf16.msra.mxu1 %v2063_v16  ;;  %v2099_v37 = vld [vmem:[#allocation8 + $0xb8] sm:$0xff]   ;;  %v2103_v42 = vld [vmem:[#allocation8 + $0xb0] sm:$0xff]   ;;  %v2107_v46 = vld [vmem:[#allocation8 + $0xa8] sm:$0xff]   ;;  %v352_v16 = vsub.s32 3, %v339_v10  ;;  %p2363_p4 = scmp.ne.s32.totalorder %s3183_s28, %s2362_s9  ;;  %p3252_p6 = scmp.ne.s32.totalorder %s3243_s29, 0 }
  0x74   : > { %574 = vmatprep.subr.bf16.mxu0 %v2064_v17  ;;  %687 = vmatprep.subr.bf16.mxu1 %v2066_v18  ;;  %v2108_v47 = vld [vmem:[#allocation8 + $0x60] sm:$0xff]   ;;  %v2090_v51 = vld [vmem:[%s2623_s13 + $0x10] sm:$0xff]   ;;  %v2112_v52 = vld [vmem:[#allocation8 + $0x58] sm:$0xff]   ;;  %s2445_s22 = smov [#allocation10]  }
  0x75   : > { %v2109_v48 = vld [vmem:[#allocation8 + $0x20] sm:$0xff]   ;;  %v2091_v53 = vld [vmem:[%s2623_s13 + $0x18] sm:$0xff]   ;;  %v2094_v56 = vld [vmem:[%s2623_s13 + $0x30] sm:$0xff]   ;;  %p2364_p12 = pnand %p2363_p4, %p3252_p6  ;;  %s2366_s7 = sshll.u32 %s2445_s22, 4  ;;  %s2367_s7 = int_to_ptr.vmem [resolvable:$false] %s2366_s7 }
  0x76   : > { %v2110_v49 = vld [vmem:[#allocation8 + $0xe0] sm:$0xff]   ;;  %v2095_v57 = vld [vmem:[%s2623_s13 + $0x38] sm:$0xff]   ;;  %v2120_v2 = vld [vmem:[#allocation8 + $0x48] sm:$0xff]   ;;  %s2368_s23 = scalar_lea.vmem %s2367_s7, 4096  ;;  %p2369_p5 = scmp.lt.s32.totalorder %s3183_s28, %s2367_s7 }
  0x77   : > { %575 = vmatpush1.bf16.msra.mxu0 %v2068_v19  ;;  %688 = vmatpush1.bf16.msra.mxu1 %v2069_v20  ;;  %v2111_v50 = vld [vmem:[#allocation8 + $0xa0] sm:$0xff]   ;;  %v2114_v58 = vld [vmem:[#allocation8 + $0xd8] sm:$0xff]   ;;  %v2116_v61 = vld [vmem:[#allocation8 + $0x50] sm:$0xff]   ;;  %p2365_p0 = pneg %p2364_p12  ;;  %p2370_p3 = scmp.lt.s32.totalorder %s2368_s23, %s2362_s9 }
  0x78   : > { %576 = vmatprep.subr.bf16.mxu0 %v2070_v21  ;;  %689 = vmatprep.subr.bf16.mxu1 %v2072_v22  ;;  %v2092_v54 = vld [vmem:[%s2623_s13 + $0x20] sm:$0xff]   ;;  %v2093_v55 = vld [vmem:[%s2623_s13 + $0x28] sm:$0xff]   ;;  %v2118_v62 = vld [vmem:[#allocation8 + $0xd0] sm:$0xff]  }
  0x79   : > { %v2113_v59 = vld [vmem:[#allocation8 + $0x18] sm:$0xff]   ;;  %v2117_v63 = vld [vmem:[#allocation8 + $0x10] sm:$0xff]   ;;  %v2122_v3 = vld [vmem:[#allocation8 + $0xc8] sm:$0xff]   ;;  %p2371_p7 = por %p2370_p3, %p2369_p5 }
  0x7a   : > { %v2115_v60 = vld [vmem:[#allocation8 + $0x98] sm:$0xff]   ;;  %v2119_v1 = vld [vmem:[#allocation8 + $0x90] sm:$0xff]   ;;  %v2123_v4 = vld [vmem:[#allocation8 + $0x88] sm:$0xff]  }
  0x7b   : > { %577 = vmatpush1.bf16.msra.mxu0 %v2074_v23  ;;  %690 = vmatpush1.bf16.msra.mxu1 %v2075_v24  ;;  %v2124_v5 = vld [vmem:[#allocation8 + $0x40] sm:$0xff]   ;;  %v336_v12 = vld [vmem:[#allocation7] sm:$0xf]  ;;  %p2372_p9 = pnand %p2371_p7, %p2365_p0 }
  0x7c   : > { %578 = vmatprep.subr.bf16.mxu0 %v2076_v25  ;;  %691 = vmatprep.subr.bf16.mxu1 %v2078_v26  ;;  %v2126_v6 = vld [vmem:[#allocation8 + $0xc0] sm:$0xff]   ;;  %v2661_v15 = vrot.slane %v336_v12, %v340_v11  ;;  %v2663_v18 = vrot.slane %v336_v12, %v348_v13  ;;  %v2665_v20 = vrot.slane %v336_v12, %v344_v14 }
  0x7d   : > { %v2125_v7 = vld [vmem:[#allocation8] sm:$0xff]   ;;  %v2668_v24 = vrot.slane %v336_v12, %v352_v16 }
  0x7e   : > { %v2127_v8 = vld [vmem:[#allocation8 + $0x80] sm:$0xff]  }
  0x7f   : > { %579 = vmatpush1.bf16.msra.mxu0 %v2080_v27  ;;  %692 = vmatpush1.bf16.msra.mxu1 %v2081_v28 }
  0x80   : > { %580 = vmatprep.subr.bf16.mxu0 %v2082_v29  ;;  %693 = vmatprep.subr.bf16.mxu1 %v2084_v30 }
  0x83   : > { %581 = vmatpush1.bf16.msra.mxu0 %v2086_v31  ;;  %694 = vmatpush1.bf16.msra.mxu1 %v2087_v32 }
  0x84   : > { %1828 = vmatprep.subr.bf16.mxu0 %v2096_v34  ;;  %1892 = vmatprep.subr.bf16.mxu1 %v2098_v36 }
  0x86   : > { %599 = vmatmul.mubr.bf16.vlgmr.msra.gmra.mxu0 %v2088_v33  ;;  %712 = vmatmul.mubr.bf16.vlgmr.msra.gmra.mxu1 %v2088_v33 }
  0x87   : > { %608 = vmatprep.mubr.bf16.mxu0 %v2444_v0  ;;  %721 = vmatprep.mubr.bf16.mxu1 %v2444_v0 }
  0x88   : > { %1829 = vmatpush3.bf16.msra.mxu0 %v2097_v35  ;;  %1893 = vmatpush3.bf16.msra.mxu1 %v2099_v37 }
  0x89   : > { %1830 = vmatprep.subr.bf16.mxu0 %v2100_v38  ;;  %1894 = vmatprep.subr.bf16.mxu1 %v2102_v40 }
  0x8c   : > { %1831 = vmatpush3.bf16.msra.mxu0 %v2101_v39  ;;  %1895 = vmatpush3.bf16.msra.mxu1 %v2103_v42 }
  0x8d   : > { %1832 = vmatprep.subr.bf16.mxu0 %v2104_v43  ;;  %1896 = vmatprep.subr.bf16.mxu1 %v2106_v45 }
  0x8e   : > { %609 = vmatmul.mubr.bf16.gmra.mxu0 %v2089_v41  ;;  %722 = vmatmul.mubr.bf16.gmra.mxu1 %v2089_v41 }
  0x8f   : > { %618 = vmatprep.mubr.bf16.mxu0 %v2444_v0  ;;  %731 = vmatprep.mubr.bf16.mxu1 %v2444_v0 }
  0x90   : > { %1833 = vmatpush3.bf16.msra.mxu0 %v2105_v44  ;;  %1897 = vmatpush3.bf16.msra.mxu1 %v2107_v46 }
  0x91   : > { %1834 = vmatprep.subr.bf16.mxu0 %v2108_v47  ;;  %1898 = vmatprep.subr.bf16.mxu1 %v2110_v49 }
  0x94   : > { %1835 = vmatpush3.bf16.msra.mxu0 %v2109_v48  ;;  %1899 = vmatpush3.bf16.msra.mxu1 %v2111_v50 }
  0x95   : > { %1836 = vmatprep.subr.bf16.mxu0 %v2112_v52  ;;  %1900 = vmatprep.subr.bf16.mxu1 %v2114_v58 }
  0x96   : > { %619 = vmatmul.mubr.bf16.gmra.mxu0 %v2090_v51  ;;  %732 = vmatmul.mubr.bf16.gmra.mxu1 %v2090_v51 }
  0x97   : > { %628 = vmatprep.mubr.bf16.mxu0 %v2444_v0  ;;  %741 = vmatprep.mubr.bf16.mxu1 %v2444_v0 }
  0x98   : > { %1837 = vmatpush3.bf16.msra.mxu0 %v2113_v59  ;;  %1901 = vmatpush3.bf16.msra.mxu1 %v2115_v60 }
  0x99   : > { %1838 = vmatprep.subr.bf16.mxu0 %v2116_v61  ;;  %1902 = vmatprep.subr.bf16.mxu1 %v2118_v62 }
  0x9c   : > { %1839 = vmatpush3.bf16.msra.mxu0 %v2117_v63  ;;  %1903 = vmatpush3.bf16.msra.mxu1 %v2119_v1 }
  0x9d   : > { %1840 = vmatprep.subr.bf16.mxu0 %v2120_v2  ;;  %1904 = vmatprep.subr.bf16.mxu1 %v2122_v3 }
  0x9e   : > { %629 = vmatmul.mubr.bf16.gmra.mxu0 %v2091_v53  ;;  %742 = vmatmul.mubr.bf16.gmra.mxu1 %v2091_v53 }
  0x9f   : > { %638 = vmatprep.mubr.bf16.mxu0 %v2444_v0  ;;  %751 = vmatprep.mubr.bf16.mxu1 %v2444_v0 }
  0xa0   : > { %1905 = vmatpush3.bf16.msra.mxu1 %v2123_v4 }
  0xa1   : > { %1906 = vmatprep.subr.bf16.mxu1 %v2126_v6 }
  0xa4   : > { %1907 = vmatpush3.bf16.msra.mxu1 %v2127_v8 }
  0xa6   : > { %639 = vmatmul.mubr.bf16.gmra.mxu0 %v2092_v54  ;;  %752 = vmatmul.mubr.bf16.gmra.mxu1 %v2092_v54 }
  0xa7   : > { %648 = vmatprep.mubr.bf16.mxu0 %v2444_v0  ;;  %761 = vmatprep.mubr.bf16.mxu1 %v2444_v0 }
  0xae   : > { %649 = vmatmul.mubr.bf16.gmra.mxu0 %v2093_v55  ;;  %762 = vmatmul.mubr.bf16.gmra.mxu1 %v2093_v55 }
  0xaf   : > { %658 = vmatprep.mubr.bf16.mxu0 %v2444_v0  ;;  %771 = vmatprep.mubr.bf16.mxu1 %v2444_v0 }
  0xb6   : > { %659 = vmatmul.mubr.bf16.gmra.mxu0 %v2094_v56  ;;  %772 = vmatmul.mubr.bf16.gmra.mxu1 %v2094_v56 }
  0xb7   : > { %668 = vmatprep.mubr.bf16.mxu0 %v2444_v0  ;;  %781 = vmatprep.mubr.bf16.mxu1 %v2444_v0  ;;  %v2121_v0 = vld [vmem:[#allocation8 + $0x8] sm:$0xff]  }
  0xb8   : > { %1841 = vmatpush3.bf16.msra.mxu0 %v2121_v0 }
  0xb9   : > { %1842 = vmatprep.subr.bf16.mxu0 %v2124_v5 }
  0xbc   : > { %1843 = vmatpush3.bf16.msra.mxu0 %v2125_v7 }
  0xbe   : > { %669 = vmatmul.mubr.bf16.gmra.mxu0 %v2095_v57  ;;  %782 = vmatmul.mubr.bf16.gmra.mxu1 %v2095_v57 }
 0x146   : > { %v600_v17 = vpop.f32.mrf.mxu0  ;;  %v713_v19 = vpop.f32.mrf.mxu1 }
 0x147   : > { %v601_v23 = vadd.f32 %v600_v17, %v2661_v15  ;;  %v714_v25 = vadd.f32 %v713_v19, %v2663_v18 }
 0x148   : > { %v602_v21 = vpop.f32.mrf.mxu0  ;;  %v715_v22 = vpop.f32.mrf.mxu1 }
 0x149   : > { %v603_v28 = vadd.f32 %v602_v21, %v2665_v20  ;;  %v856_v32 = vmul.f32 0.70710677, %v601_v23  ;;  %v716_v33 = vadd.f32 %v715_v22, %v2668_v24  ;;  %v858_v34 = vmul.f32 0.70710677, %v714_v25 }
 0x14a   : > { %v604_v26 = vpop.f32.mrf.mxu0  ;;  %v717_v27 = vpop.f32.mrf.mxu1  ;;  %v792_v5 = vmul.f32 0.5, %v601_v23  ;;  %v2686_v6 = vmul.f32 0.5, %v714_v25 }
 0x14b   : > { %v605_v29 = vadd.f32 %v604_v26, %v2661_v15  ;;  %v718_v35 = vadd.f32 %v717_v27, %v2663_v18  ;;  %v857_v38 = vmul.f32 0.70710677, %v603_v28  ;;  %2128 = verf.f32 %v856_v32 }
 0x14c   : > { %v606_v30 = vpop.f32.mrf.mxu0  ;;  %v719_v31 = vpop.f32.mrf.mxu1  ;;  %v859_v43 = vmul.f32 0.70710677, %v716_v33  ;;  %2130 = verf.f32 %v858_v34  ;;  %v2693_v11 = vmul.f32 0.5, %v603_v28  ;;  %v2696_v16 = vmul.f32 0.5, %v716_v33 }
 0x14d   : > { %v860_v39 = vmul.f32 0.70710677, %v605_v29  ;;  %v607_v40 = vadd.f32 %v606_v30, %v2665_v20  ;;  %v720_v44 = vadd.f32 %v719_v31, %v2668_v24  ;;  %v862_v45 = vmul.f32 0.70710677, %v718_v35 }
 0x14e   : > { %v610_v36 = vpop.f32.mrf.mxu0  ;;  %v723_v37 = vpop.f32.mrf.mxu1  ;;  %2132 = verf.f32 %v857_v38  ;;  %v796_v17 = vmul.f32 0.5, %v605_v29  ;;  %v2698_v19 = vmul.f32 0.5, %v718_v35 }
 0x14f   : > { %v611_v46 = vadd.f32 %v610_v36, %v2661_v15  ;;  %v724_v49 = vadd.f32 %v723_v37, %v2663_v18  ;;  %2134 = verf.f32 %v860_v39  ;;  %v861_v50 = vmul.f32 0.70710677, %v607_v40 }
 0x150   : > { %v612_v41 = vpop.f32.mrf.mxu0  ;;  %v725_v42 = vpop.f32.mrf.mxu1  ;;  %2136 = verf.f32 %v859_v43  ;;  %v863_v54 = vmul.f32 0.70710677, %v720_v44  ;;  %v2704_v26 = vmul.f32 0.5, %v607_v40  ;;  %v2706_v27 = vmul.f32 0.5, %v720_v44 }
 0x151   : > { %v613_v51 = vadd.f32 %v612_v41, %v2665_v20  ;;  %v726_v55 = vadd.f32 %v725_v42, %v2668_v24  ;;  %2138 = verf.f32 %v862_v45  ;;  %v864_v56 = vmul.f32 0.70710677, %v611_v46 }
 0x152   : > { %v614_v47 = vpop.f32.mrf.mxu0  ;;  %v727_v48 = vpop.f32.mrf.mxu1  ;;  %v866_v59 = vmul.f32 0.70710677, %v724_v49  ;;  %2140 = verf.f32 %v861_v50  ;;  %v2708_v28 = vmul.f32 0.5, %v611_v46  ;;  %v2711_v32 = vmul.f32 0.5, %v724_v49 }
 0x153   : > { %v865_v60 = vmul.f32 0.70710677, %v613_v51  ;;  %v615_v61 = vadd.f32 %v614_v47, %v2661_v15  ;;  %2142 = verf.f32 %v863_v54  ;;  %v867_v1 = vmul.f32 0.70710677, %v726_v55 }
 0x154   : > { %v616_v52 = vpop.f32.mrf.mxu0  ;;  %v729_v53 = vpop.f32.mrf.mxu1  ;;  %v728_v2 = vadd.f32 %v727_v48, %v2663_v18  ;;  %2144 = verf.f32 %v864_v56  ;;  %v2718_v37 = vmul.f32 0.5, %v613_v51  ;;  %v2720_v38 = vmul.f32 0.5, %v726_v55 }
 0x155   : > { %v617_v3 = vadd.f32 %v616_v52, %v2665_v20  ;;  %2146 = verf.f32 %v866_v59  ;;  %v868_v7 = vmul.f32 0.70710677, %v615_v61  ;;  %v730_v8 = vadd.f32 %v729_v53, %v2668_v24 }
 0x156   : > { %v620_v57 = vpop.f32.mrf.mxu0  ;;  %v733_v58 = vpop.f32.mrf.mxu1  ;;  %2148 = verf.f32 %v865_v60  ;;  %v870_v12 = vmul.f32 0.70710677, %v728_v2  ;;  %v2722_v42 = vmul.f32 0.5, %v615_v61  ;;  %v2729_v48 = vmul.f32 0.5, %v728_v2 }
 0x157   : > { %2150 = verf.f32 %v867_v1  ;;  %v621_v13 = vadd.f32 %v620_v57, %v2661_v15  ;;  %v869_v21 = vmul.f32 0.70710677, %v617_v3  ;;  %v734_v30 = vadd.f32 %v733_v58, %v2663_v18 }
 0x158   : > { %v622_v62 = vpop.f32.mrf.mxu0  ;;  %v735_v63 = vpop.f32.mrf.mxu1  ;;  %2152 = verf.f32 %v868_v7  ;;  %v871_v29 = vmul.f32 0.70710677, %v730_v8  ;;  %v2731_v49 = vmul.f32 0.5, %v617_v3  ;;  %v2737_v58 = vmul.f32 0.5, %v730_v8 }
 0x159   : > { %v2129_v14 = vpop.eup %2128  ;;  %v623_v33 = vadd.f32 %v622_v62, %v2665_v20  ;;  %2154 = verf.f32 %v870_v12  ;;  %v872_v39 = vmul.f32 0.70710677, %v621_v13  ;;  %v736_v43 = vadd.f32 %v735_v63, %v2668_v24 }
 0x15a   : > { %v624_v0 = vpop.f32.mrf.mxu0  ;;  %v2684_v4 = vpop.f32.mrf.mxu1  ;;  %v984_v41 = vadd.f32 1.0, %v2129_v14  ;;  %2156 = verf.f32 %v869_v21  ;;  %v874_v50 = vmul.f32 0.70710677, %v734_v30  ;;  %v2742_v63 = vmul.f32 0.5, %v621_v13 }
 0x15b   : > { %v2131_v25 = vpop.eup %2130  ;;  %2158 = verf.f32 %v871_v29  ;;  %v873_v53 = vmul.f32 0.70710677, %v623_v33  ;;  %v625_v59 = vadd.f32 %v624_v0, %v2661_v15  ;;  %v875_v1 = vmul.f32 0.70710677, %v736_v43 }
 0x15c   : > { %v2689_v9 = vpop.f32.mrf.mxu0  ;;  %v2691_v10 = vpop.f32.mrf.mxu1  ;;  %v986_v47 = vadd.f32 1.0, %v2131_v25  ;;  %2160 = verf.f32 %v872_v39  ;;  %v2740_v61 = vmul.f32 %v984_v41, %v792_v5  ;;  %v2751_v8 = vmul.f32 0.5, %v734_v30 }
 0x15d   : > { %v2133_v31 = vpop.eup %2132  ;;  %2162 = verf.f32 %v874_v50  ;;  %v738_v0 = vadd.f32 %v2684_v4, %v2663_v18  ;;  %v627_v21 = vadd.f32 %v2689_v9, %v2665_v20  ;;  %v876_v29 = vmul.f32 0.70710677, %v625_v59 }
 0x15e   : > { %v2700_v22 = vpop.f32.mrf.mxu0  ;;  %v2702_v23 = vpop.f32.mrf.mxu1  ;;  %v985_v51 = vadd.f32 1.0, %v2133_v31  ;;  %v2749_v12 = vmul.f32 %v986_v47, %v2686_v6  ;;  %2164 = verf.f32 %v873_v53  ;;  %v2765_v31 = vmul.f32 0.5, %v623_v33 }
 0x15f   : > { %v2135_v36 = vpop.eup %2134  ;;  %2166 = verf.f32 %v875_v1  ;;  %v740_v39 = vadd.f32 %v2691_v10, %v2668_v24  ;;  %v878_v41 = vmul.f32 0.70710677, %v738_v0  ;;  %v631_v33 = vadd.f32 %v2700_v22, %v2661_v15 }
 0x160   : > { %v2714_v34 = vpop.f32.mrf.mxu0  ;;  %v2716_v35 = vpop.f32.mrf.mxu1  ;;  %v988_v52 = vadd.f32 1.0, %v2135_v36  ;;  %v2756_v14 = vmul.f32 %v985_v51, %v2693_v11  ;;  %v877_v50 = vmul.f32 0.70710677, %v627_v21  ;;  %v2786_v10 = vadd.f32 %v2702_v23, %v2663_v18 }
 0x161   : > { %v2137_v40 = vpop.eup %2136  ;;  %2168 = verf.f32 %v876_v29  ;;  %v880_v23 = vmul.f32 0.70710677, %v631_v33 }
 0x162   : > { %v2725_v44 = vpop.f32.mrf.mxu0  ;;  %v2727_v45 = vpop.f32.mrf.mxu1  ;;  %v987_v57 = vadd.f32 1.0, %v2137_v40  ;;  %v2758_v13 = vmul.f32 %v988_v52, %v796_v17 }
 0x163   : > { %v2139_v46 = vpop.eup %2138  ;;  %2170 = verf.f32 %v878_v41 }
 0x164   : > { %v2733_v54 = vpop.f32.mrf.mxu0  ;;  %v2735_v55 = vpop.f32.mrf.mxu1  ;;  %v990_v62 = vadd.f32 1.0, %v2139_v46  ;;  %v2763_v6 = vmul.f32 %v987_v57, %v2696_v16  ;;  %v2776_v16 = vmul.f32 0.5, %v736_v43  ;;  %v1112_v46 = vpack.c.bf16 %v2758_v13, %v2740_v61 }
 0x165   : > { %v2141_v56 = vpop.eup %2140  ;;  %2172 = verf.f32 %v877_v50 }
 0x166   : > { %v2143_v60 = vpop.eup %2142  ;;  %v2744_v2 = vpop.f32.mrf.mxu0  ;;  %v989_v30 = vadd.f32 1.0, %v2141_v56  ;;  %v2770_v11 = vmul.f32 %v990_v62, %v2698_v19  ;;  %v2782_v19 = vmul.f32 0.5, %v625_v59 }
 0x167   : > { %v2746_v3 = vpop.f32.mrf.mxu1  ;;  %v2145_v7 = vpop.eup %2144  ;;  %v991_v17 = vadd.f32 1.0, %v2143_v60  ;;  %v879_v60 = vmul.f32 0.70710677, %v740_v39 }
 0x168   : > { %v2147_v5 = vpop.eup %2146  ;;  %v2767_v36 = vpop.f32.mrf.mxu0  ;;  %v992_v40 = vadd.f32 1.0, %v2145_v7  ;;  %v1114_v22 = vpack.c.bf16 %v2770_v11, %v2749_v12  ;;  %v1053_v57 = vmul.f32 %v989_v30, %v2704_v26  ;;  %v633_v7 = vadd.f32 %v2714_v34, %v2665_v20 }
 0x169   : > { %v2149_v25 = vpop.eup %2148  ;;  %v2774_v9 = vpop.f32.mrf.mxu1  ;;  %v994_v47 = vadd.f32 1.0, %v2147_v5  ;;  %v1055_v59 = vmul.f32 %v991_v17, %v2706_v27  ;;  %v2806_v26 = vadd.f32 %v2716_v35, %v2668_v24  ;;  %v882_v34 = vmul.f32 0.70710677, %v2786_v10 }
 0x16a   : > { %v2151_v4 = vpop.eup %2150  ;;  %v993_v52 = vadd.f32 1.0, %v2149_v25  ;;  %v2788_v43 = vpop.f32.mrf.mxu0  ;;  %v2797_v1 = vmul.f32 %v992_v40, %v2708_v28  ;;  %v2814_v25 = vmul.f32 0.5, %v738_v0  ;;  %2174 = verf.f32 %v879_v60 }
 0x16b   : > { %v2153_v51 = vpop.eup %2152  ;;  %v995_v53 = vadd.f32 1.0, %v2151_v4  ;;  %v2794_v61 = vpop.f32.mrf.mxu1  ;;  %v2802_v5 = vmul.f32 %v994_v47, %v2711_v32  ;;  %v635_v35 = vadd.f32 %v2725_v44, %v2661_v15  ;;  %2176 = verf.f32 %v880_v23 }
 0x16c   : > { %v2155_v56 = vpop.eup %2154  ;;  %v996_v12 = vadd.f32 1.0, %v2153_v51  ;;  %v2809_v13 = vmul.f32 %v993_v52, %v2718_v37  ;;  %v2817_v30 = vpop.f32.mrf.mxu0  ;;  %v2823_v37 = vmul.f32 0.5, %v627_v21  ;;  %v1113_v0 = vpack.c.bf16 %v1053_v57, %v2756_v14 }
 0x16d   : > { %v2157_v62 = vpop.eup %2156  ;;  %v2812_v28 = vmul.f32 %v995_v53, %v2720_v38  ;;  %v998_v29 = vadd.f32 1.0, %v2155_v56  ;;  %v2821_v11 = vpop.f32.mrf.mxu1  ;;  %v881_v38 = vmul.f32 0.70710677, %v633_v7  ;;  %v883_v47 = vmul.f32 0.70710677, %v2806_v26 }
 0x16e   : > { %v2159_v27 = vpop.eup %2158  ;;  %v997_v4 = vadd.f32 1.0, %v2157_v62  ;;  %v2827_v40 = vmul.f32 %v996_v12, %v2722_v42  ;;  %v1115_v50 = vpack.c.bf16 %v1055_v59, %v2763_v6  ;;  %v2831_v44 = vmul.f32 0.5, %v740_v39  ;;  %1439 = vmatprep.mubr.bf16.mxu0 %v1113_v0  ;;  %v2835_v53 = vpop.f32.mrf.mxu0 }
 0x16f   : > { %v2161_v32 = vpop.eup %2160  ;;  %v999_v41 = vadd.f32 1.0, %v2159_v27  ;;  %2178 = verf.f32 %v882_v34  ;;  %v748_v21 = vadd.f32 %v2727_v45, %v2663_v18  ;;  %v2838_v14 = vmul.f32 %v998_v29, %v2729_v48  ;;  %1440 = vmatmul.mubr.bf16.vlgmr.msra.gmra.mxu0 %v1112_v46  ;;  %v2843_v39 = vpop.f32.mrf.mxu1 }
 0x170   : > { %v2163_v17 = vpop.eup %2162  ;;  %v1000_v52 = vadd.f32 1.0, %v2161_v32  ;;  %v1061_v42 = vmul.f32 %v997_v4, %v2731_v49  ;;  %v884_v56 = vmul.f32 0.70710677, %v635_v35  ;;  %v637_v6 = vadd.f32 %v2733_v54, %v2665_v20  ;;  %1536 = vmatprep.mubr.bf16.mxu1 %v1115_v50  ;;  %v2860_v12 = vpop.f32.mrf.mxu0 }
 0x171   : > { %v2165_v51 = vpop.eup %2164  ;;  %v1002_v59 = vadd.f32 1.0, %v2163_v17  ;;  %v2845_v60 = vmul.f32 0.5, %v631_v33  ;;  %2180 = verf.f32 %v881_v38  ;;  %v750_v45 = vadd.f32 %v2735_v55, %v2668_v24  ;;  %1537 = vmatmul.mubr.bf16.vlgmr.msra.gmra.mxu1 %v1114_v22 }
 0x172   : > { %v2167_v57 = vpop.eup %2166  ;;  %v1063_v48 = vmul.f32 %v999_v41, %v2737_v58  ;;  %v1001_v49 = vadd.f32 1.0, %v2165_v51  ;;  %2182 = verf.f32 %v883_v47  ;;  %v641_v54 = vadd.f32 %v2744_v2, %v2661_v15  ;;  %v2864_v2 = vpop.f32.mrf.mxu1 }
 0x173   : > { %v2853_v46 = vmul.f32 %v1000_v52, %v2742_v63  ;;  %v2856_v62 = vmul.f32 0.5, %v2786_v10  ;;  %v886_v33 = vmul.f32 0.70710677, %v748_v21  ;;  %v754_v23 = vadd.f32 %v2746_v3, %v2663_v18  ;;  %v2169_v55 = vpop.eup %2168  ;;  %v2883_v41 = vpop.f32.mrf.mxu0 }
 0x174   : > { %v1003_v22 = vadd.f32 1.0, %v2167_v57  ;;  %2184 = verf.f32 %v884_v56  ;;  %v885_v58 = vmul.f32 0.70710677, %v637_v6  ;;  %v643_v27 = vadd.f32 %v2767_v36, %v2665_v20  ;;  %v2171_v32 = vpop.eup %2170 }
 0x175   : > { %v2867_v63 = vmul.f32 %v1002_v59, %v2751_v8  ;;  %v2869_v10 = vmul.f32 0.5, %v633_v7  ;;  %v887_v34 = vmul.f32 0.70710677, %v750_v45  ;;  %v756_v3 = vadd.f32 %v2774_v9, %v2668_v24  ;;  %v2173_v0 = vpop.eup %2172 }
 0x176   : > { %v2874_v29 = vmul.f32 %v1001_v49, %v2765_v31  ;;  %v2877_v4 = vmul.f32 0.5, %v2806_v26  ;;  %v2879_v38 = vmul.f32 0.5, %v635_v35  ;;  %v888_v36 = vmul.f32 0.70710677, %v641_v54  ;;  %v2890_v26 = vpop.f32.mrf.mxu1 }
 0x177   : > { %v1004_v17 = vadd.f32 1.0, %v2169_v55  ;;  %v2881_v8 = vmul.f32 0.5, %v748_v21  ;;  %2186 = verf.f32 %v886_v33  ;;  %v890_v7 = vmul.f32 0.70710677, %v754_v23  ;;  %v2175_v35 = vpop.eup %2174  ;;  %v656_v33 = vpop.f32.mrf.mxu0 }
 0x178   : > { %v2886_v9 = vmul.f32 %v1003_v22, %v2776_v16  ;;  %v2888_v47 = vmul.f32 0.5, %v637_v6  ;;  %2188 = verf.f32 %v885_v58  ;;  %v889_v31 = vmul.f32 0.70710677, %v643_v27  ;;  %v2177_v21 = vpop.eup %2176 }
 0x179   : > { %v1006_v50 = vadd.f32 1.0, %v2171_v32  ;;  %2190 = verf.f32 %v887_v34  ;;  %v891_v51 = vmul.f32 0.70710677, %v756_v3  ;;  %v1117_v52 = vpack.c.bf16 %v1061_v42, %v2809_v13 }
 0x17a   : > { %v1005_v56 = vadd.f32 1.0, %v2173_v0  ;;  %2192 = verf.f32 %v888_v36  ;;  %v645_v57 = vadd.f32 %v2788_v43, %v2661_v15  ;;  %v1119_v16 = vpack.c.bf16 %v1063_v48, %v2812_v28  ;;  %v769_v28 = vpop.f32.mrf.mxu1  ;;  %v2921_v0 = vpop.f32.mrf.mxu0 }
 0x17b   : > { %v2897_v6 = vmul.f32 %v1004_v17, %v2782_v19  ;;  %v2899_v59 = vmul.f32 0.5, %v750_v45  ;;  %2194 = verf.f32 %v890_v7  ;;  %v758_v49 = vadd.f32 %v2794_v61, %v2663_v18  ;;  %1447 = vmatprep.mubr.bf16.mxu0 %v1117_v52 }
 0x17c   : > { %v2179_v13 = vpop.eup %2178  ;;  %v1007_v42 = vadd.f32 1.0, %v2175_v35  ;;  %v2903_v55 = vmul.f32 0.5, %v641_v54  ;;  %2196 = verf.f32 %v889_v31  ;;  %v647_v43 = vadd.f32 %v2817_v30, %v2665_v20  ;;  %1544 = vmatprep.mubr.bf16.mxu1 %v1119_v16 }
 0x17d   : > { %v2908_v19 = vmul.f32 %v1006_v50, %v2814_v25  ;;  %v1008_v45 = vadd.f32 1.0, %v2177_v21  ;;  %v2910_v48 = vmul.f32 0.5, %v754_v23  ;;  %2198 = verf.f32 %v891_v51  ;;  %v662_v51 = vpop.f32.mrf.mxu0 }
 0x17e   : > { %v2181_v61 = vpop.eup %2180  ;;  %v1069_v22 = vmul.f32 %v1005_v56, %v2823_v37  ;;  %v2913_v58 = vmul.f32 0.5, %v643_v27  ;;  %v892_v54 = vmul.f32 0.70710677, %v645_v57  ;;  %v1116_v34 = vpack.c.bf16 %v2827_v40, %v2797_v1  ;;  %v2932_v40 = vpop.f32.mrf.mxu1 }
 0x17f   : > { %v2183_v32 = vpop.eup %2182  ;;  %v1010_v30 = vadd.f32 1.0, %v2179_v13  ;;  %v894_v36 = vmul.f32 0.70710677, %v758_v49  ;;  %v760_v25 = vadd.f32 %v2821_v11, %v2668_v24  ;;  %v1118_v23 = vpack.c.bf16 %v2838_v14, %v2802_v5 }
 0x180   : > { %v2924_v17 = vmul.f32 %v1007_v42, %v2831_v44  ;;  %v2926_v37 = vmul.f32 0.5, %v756_v3  ;;  %v893_v27 = vmul.f32 0.70710677, %v647_v43  ;;  %v2930_v1 = vadd.f32 %v2835_v53, %v2661_v15  ;;  %1448 = vmatmul.mubr.bf16.gmra.mxu0 %v1116_v34 }
 0x181   : > { %v2185_v7 = vpop.eup %2184  ;;  %v2935_v11 = vmul.f32 %v1008_v45, %v2845_v60  ;;  %v1009_v5 = vadd.f32 1.0, %v2181_v61  ;;  %v2937_v14 = vmul.f32 0.5, %v645_v57  ;;  %v2941_v44 = vadd.f32 %v2843_v39, %v2663_v18  ;;  %1545 = vmatmul.mubr.bf16.gmra.mxu1 %v1118_v23  ;;  %v775_v57 = vpop.f32.mrf.mxu1 }
 0x182   : > { %v1011_v3 = vadd.f32 1.0, %v2183_v32  ;;  %2200 = verf.f32 %v892_v54  ;;  %v2943_v31 = vmul.f32 0.5, %v758_v49  ;;  %v2947_v53 = vadd.f32 %v2860_v12, %v2665_v20 }
 0x183   : > { %v2950_v35 = vmul.f32 %v1010_v30, %v2856_v62  ;;  %2202 = verf.f32 %v894_v36  ;;  %v2952_v60 = vmul.f32 0.5, %v647_v43  ;;  %v895_v50 = vmul.f32 0.70710677, %v760_v25  ;;  %v777_v30 = vpop.f32.mrf.mxu1 }
 0x184   : > { %v2187_v52 = vpop.eup %2186  ;;  %v1012_v39 = vadd.f32 1.0, %v2185_v7  ;;  %2204 = verf.f32 %v893_v27  ;;  %v896_v21 = vmul.f32 0.70710677, %v2930_v1  ;;  %v2956_v56 = vadd.f32 %v656_v33, %v2665_v20 }
 0x185   : > { %v2189_v16 = vpop.eup %2188  ;;  %v898_v12 = vmul.f32 0.70710677, %v2941_v44  ;;  %v766_v62 = vadd.f32 %v2864_v2, %v2668_v24  ;;  %v2962_v49 = vadd.f32 %v769_v28, %v2668_v24  ;;  %v1121_v13 = vpack.c.bf16 %v1069_v22, %v2874_v29  ;;  %v664_v29 = vpop.f32.mrf.mxu0 }
 0x186   : > { %v2191_v42 = vpop.eup %2190  ;;  %v2966_v43 = vmul.f32 %v1009_v5, %v2869_v10  ;;  %v2969_v45 = vmul.f32 %v1011_v3, %v2877_v4  ;;  %v2971_v33 = vmul.f32 0.5, %v760_v25  ;;  %v897_v61 = vmul.f32 0.70710677, %v2947_v53 }
 0x187   : > { %v2193_v54 = vpop.eup %2192  ;;  %v1014_v34 = vadd.f32 1.0, %v2187_v52  ;;  %2206 = verf.f32 %v895_v50  ;;  %v655_v2 = vadd.f32 %v2883_v41, %v2661_v15  ;;  %v901_v28 = vmul.f32 0.70710677, %v2956_v56  ;;  %1455 = vmatprep.mubr.bf16.mxu0 %v1121_v13 }
 0x188   : > { %v2195_v22 = vpop.eup %2194  ;;  %v2978_v10 = vmul.f32 %v1012_v39, %v2879_v38  ;;  %v1013_v4 = vadd.f32 1.0, %v2189_v16  ;;  %2208 = verf.f32 %v896_v21  ;;  %v903_v32 = vmul.f32 0.70710677, %v2962_v49  ;;  %v666_v39 = vpop.f32.mrf.mxu0 }
 0x189   : > { %v2197_v36 = vpop.eup %2196  ;;  %v1015_v25 = vadd.f32 1.0, %v2191_v42  ;;  %2210 = verf.f32 %v898_v12  ;;  %v899_v23 = vmul.f32 0.70710677, %v766_v62  ;;  %v1123_v41 = vpack.c.bf16 %v2924_v17, %v2886_v9 }
 0x18a   : > { %v2199_v27 = vpop.eup %2198  ;;  %v1016_v7 = vadd.f32 1.0, %v2193_v54  ;;  %2212 = verf.f32 %v897_v61  ;;  %v768_v5 = vadd.f32 %v2890_v26, %v2663_v18  ;;  %v1120_v38 = vpack.c.bf16 %v2897_v6, %v2853_v46  ;;  %v779_v26 = vpop.f32.mrf.mxu1 }
 0x18b   : > { %v2988_v3 = vmul.f32 %v1014_v34, %v2881_v8  ;;  %v900_v50 = vmul.f32 0.70710677, %v655_v2  ;;  %2214 = verf.f32 %v901_v28  ;;  %1552 = vmatprep.mubr.bf16.mxu1 %v1123_v41  ;;  %v1122_v52 = vpack.c.bf16 %v2908_v19, %v2867_v63  ;;  %v670_v61 = vpop.f32.mrf.mxu0 }
 0x18c   : > { %v1018_v9 = vadd.f32 1.0, %v2195_v22  ;;  %v1017_v17 = vadd.f32 1.0, %v2197_v36  ;;  %2216 = verf.f32 %v903_v32  ;;  %1456 = vmatmul.mubr.bf16.gmra.mxu0 %v1120_v38  ;;  %v2993_v21 = vadd.f32 %v662_v51, %v2665_v20 }
 0x18d   : > { %v1077_v46 = vmul.f32 %v1013_v4, %v2888_v47  ;;  %v1019_v6 = vadd.f32 1.0, %v2199_v27  ;;  %2218 = verf.f32 %v899_v23  ;;  %1553 = vmatmul.mubr.bf16.gmra.mxu1 %v1122_v52  ;;  %v2997_v8 = vadd.f32 %v775_v57, %v2668_v24 }
 0x18e   : > { %v1079_v16 = vmul.f32 %v1015_v25, %v2899_v59  ;;  %v3001_v63 = vmul.f32 %v1016_v7, %v2903_v55  ;;  %v3004_v19 = vmul.f32 0.5, %v2947_v53  ;;  %v902_v12 = vmul.f32 0.70710677, %v768_v5 }
 0x18f   : > { %v2201_v51 = vpop.eup %2200  ;;  %v3006_v13 = vmul.f32 0.5, %v766_v62  ;;  %v3008_v42 = vmul.f32 0.5, %v655_v2  ;;  %2220 = verf.f32 %v900_v50  ;;  %v905_v47 = vmul.f32 0.70710677, %v2993_v21  ;;  %v3021_v62 = vpop.f32.mrf.mxu1 }
 0x190   : > { %v2203_v57 = vpop.eup %2202  ;;  %v3012_v54 = vmul.f32 %v1018_v9, %v2910_v48  ;;  %v3015_v59 = vmul.f32 %v1017_v17, %v2913_v58  ;;  %v907_v55 = vmul.f32 0.70710677, %v2997_v8  ;;  %v3019_v53 = vadd.f32 %v666_v39, %v2665_v20 }
 0x191   : > { %v2205_v34 = vpop.eup %2204  ;;  %v3024_v2 = vmul.f32 %v1019_v6, %v2926_v37  ;;  %v3027_v28 = vadd.f32 %v664_v29, %v2661_v15  ;;  %v3030_v48 = vadd.f32 %v779_v26, %v2668_v24  ;;  %v1125_v58 = vpack.c.bf16 %v1077_v46, %v2966_v43  ;;  %v672_v29 = vpop.f32.mrf.mxu0 }
 0x192   : > { %v1020_v22 = vadd.f32 1.0, %v2201_v51  ;;  %v3033_v4 = vmul.f32 0.5, %v768_v5  ;;  %2222 = verf.f32 %v902_v12  ;;  %v3036_v32 = vadd.f32 %v777_v30, %v2663_v18  ;;  %v785_v27 = vpop.f32.mrf.mxu1 }
 0x193   : > { %v1022_v36 = vadd.f32 1.0, %v2203_v57  ;;  %v3039_v25 = vmul.f32 0.5, %v2956_v56  ;;  %v3043_v37 = vadd.f32 %v2921_v0, %v2661_v15  ;;  %2224 = verf.f32 %v905_v47  ;;  %1463 = vmatprep.mubr.bf16.mxu0 %v1125_v58  ;;  %v674_v46 = vpop.f32.mrf.mxu0 }
 0x194   : > { %v2207_v23 = vpop.eup %2206  ;;  %v1021_v43 = vadd.f32 1.0, %v2205_v34  ;;  %v3047_v41 = vadd.f32 %v2932_v40, %v2663_v18  ;;  %2226 = verf.f32 %v907_v55  ;;  %v909_v30 = vmul.f32 0.70710677, %v3019_v53 }
 0x195   : > { %v2209_v7 = vpop.eup %2208  ;;  %v908_v56 = vmul.f32 0.70710677, %v3027_v28  ;;  %v911_v5 = vmul.f32 0.70710677, %v3030_v48  ;;  %v1127_v0 = vpack.c.bf16 %v1079_v16, %v2969_v45  ;;  %v3054_v38 = vadd.f32 %v670_v61, %v2661_v15 }
 0x196   : > { %v3056_v50 = vpop.eup %2210  ;;  %v839_v52 = vmul.f32 0.5, %v2962_v49  ;;  %v910_v40 = vmul.f32 0.70710677, %v3036_v32  ;;  %2228 = verf.f32 %v909_v30  ;;  %v1124_v39 = vpack.c.bf16 %v2978_v10, %v2935_v11  ;;  %v787_v10 = vpop.f32.mrf.mxu1 }
 0x197   : > { %v2213_v9 = vpop.eup %2212  ;;  %v3063_v17 = vmul.f32 %v1020_v22, %v2937_v14  ;;  %v1023_v26 = vadd.f32 1.0, %v2207_v23  ;;  %v904_v45 = vmul.f32 0.70710677, %v3043_v37  ;;  %2230 = verf.f32 %v911_v5  ;;  %1560 = vmatprep.mubr.bf16.mxu1 %v1127_v0 }
 0x198   : > { %v2215_v6 = vpop.eup %2214  ;;  %v3067_v16 = vmul.f32 %v1022_v36, %v2943_v31  ;;  %v1085_v49 = vmul.f32 %v1021_v43, %v2952_v60  ;;  %v3070_v12 = vadd.f32 1.0, %v2209_v7  ;;  %v906_v11 = vmul.f32 0.70710677, %v3047_v41  ;;  %1464 = vmatmul.mubr.bf16.gmra.mxu0 %v1124_v39  ;;  %v789_v43 = vpop.f32.mrf.mxu1 }
 0x199   : > { %v2217_v14 = vpop.eup %2216  ;;  %2232 = verf.f32 %v908_v56  ;;  %v912_v51 = vmul.f32 0.70710677, %v3054_v38  ;;  %v1126_v47 = vpack.c.bf16 %v2988_v3, %v2950_v35  ;;  %v3077_v61 = vadd.f32 %v672_v29, %v2665_v20  ;;  %v676_v3 = vpop.f32.mrf.mxu0 }
 0x19a   : > { %v2219_v31 = vpop.eup %2218  ;;  %v1025_v57 = vadd.f32 1.0, %v2213_v9  ;;  %2234 = verf.f32 %v910_v40  ;;  %v3080_v60 = vadd.f32 %v785_v27, %v2668_v24  ;;  %v3083_v55 = vadd.f32 %v674_v46, %v2661_v15 }
 0x19b   : > { %v1087_v34 = vmul.f32 %v1023_v26, %v2971_v33  ;;  %2236 = verf.f32 %v904_v45  ;;  %1561 = vmatmul.mubr.bf16.gmra.mxu1 %v1126_v47  ;;  %v913_v58 = vmul.f32 0.70710677, %v3077_v61  ;;  %v3088_v35 = vadd.f32 %v787_v10, %v2663_v18 }
 0x19c   : > { %v2221_v22 = vpop.eup %2220  ;;  %v1029_v36 = vadd.f32 1.0, %v2215_v6  ;;  %v1031_v29 = vadd.f32 1.0, %v2217_v14  ;;  %2238 = verf.f32 %v906_v11  ;;  %v915_v23 = vmul.f32 0.70710677, %v3080_v60 }
 0x19d   : > { %v1027_v30 = vadd.f32 1.0, %v2219_v31  ;;  %2240 = verf.f32 %v912_v51  ;;  %v3093_v15 = vadd.f32 %v3021_v62, %v2663_v18  ;;  %v916_v33 = vmul.f32 0.70710677, %v3083_v55 }
 0x19e   : > { %v1089_v27 = vmul.f32 %v1025_v57, %v3004_v19  ;;  %2242 = verf.f32 %v913_v58  ;;  %v918_v7 = vmul.f32 0.70710677, %v3088_v35  ;;  %v3099_v56 = vadd.f32 %v676_v3, %v2665_v20 }
 0x19f   : > { %v2223_v5 = vpop.eup %2222  ;;  %v1028_v0 = vadd.f32 1.0, %v2221_v22  ;;  %2244 = verf.f32 %v915_v23  ;;  %v3102_v40 = vadd.f32 %v789_v43, %v2668_v24  ;;  %v1129_v39 = vpack.c.bf16 %v1085_v49, %v3015_v59 }
 0x1a0   : > { %v2225_v18 = vpop.eup %2224  ;;  %v1093_v62 = vmul.f32 %v1029_v36, %v3039_v25  ;;  %v1095_v9 = vmul.f32 %v1031_v29, %v839_v52  ;;  %2246 = verf.f32 %v916_v33  ;;  %v917_v19 = vmul.f32 0.70710677, %v3099_v56 }
 0x1a1   : > { %v2227_v26 = vpop.eup %2226  ;;  %v845_v45 = vmul.f32 0.5, %v3019_v53  ;;  %v914_v20 = vmul.f32 0.70710677, %v3093_v15  ;;  %2248 = verf.f32 %v918_v7  ;;  %v919_v46 = vmul.f32 0.70710677, %v3102_v40  ;;  %1471 = vmatprep.mubr.bf16.mxu0 %v1129_v39 }
 0x1a2   : > { %v1091_v24 = vmul.f32 %v1027_v30, %v3006_v13  ;;  %v1030_v6 = vadd.f32 1.0, %v2223_v5  ;;  %2250 = verf.f32 %v917_v19  ;;  %v1131_v59 = vpack.c.bf16 %v1087_v34, %v3024_v2 }
 0x1a3   : > { %v2229_v25 = vpop.eup %2228  ;;  %v1033_v52 = vadd.f32 1.0, %v2225_v18  ;;  %2252 = verf.f32 %v919_v46  ;;  %v1128_v49 = vpack.c.bf16 %v3063_v17, %v3001_v63  ;;  %v1130_v53 = vpack.c.bf16 %v3067_v16, %v3012_v54 }
 0x1a4   : > { %v2231_v11 = vpop.eup %2230  ;;  %v1035_v10 = vadd.f32 1.0, %v2227_v26  ;;  %v1037_v14 = vadd.f32 1.0, %v2229_v25  ;;  %1568 = vmatprep.mubr.bf16.mxu1 %v1131_v59  ;;  %v1133_v51 = vpack.c.bf16 %v1093_v62, %v1089_v27  ;;  %v1135_v47 = vpack.c.bf16 %v1095_v9, %v1091_v24 }
 0x1a5   : > { %v1026_v13 = vadd.f32 1.0, %v3056_v50  ;;  %v847_v31 = vmul.f32 0.5, %v3030_v48  ;;  %v1039_v2 = vadd.f32 1.0, %v2231_v11  ;;  %2254 = verf.f32 %v914_v20  ;;  %1472 = vmatmul.mubr.bf16.gmra.mxu0 %v1128_v49  ;;  %1569 = vmatmul.mubr.bf16.gmra.mxu1 %v1130_v53 }
 0x1a6   : > { %v2233_v57 = vpop.eup %2232  ;;  %v832_v63 = vmul.f32 0.5, %v2930_v1  ;;  %v841_v17 = vmul.f32 0.5, %v2993_v21  ;;  %v843_v54 = vmul.f32 0.5, %v2997_v8  ;;  %v1101_v16 = vmul.f32 %v1037_v14, %v845_v45  ;;  %1479 = vmatprep.mubr.bf16.mxu0 %v1133_v51  ;;  %1576 = vmatprep.mubr.bf16.mxu1 %v1135_v47 }
 0x1a7   : > { %v2235_v34 = vpop.eup %2234  ;;  %v834_v58 = vmul.f32 0.5, %v2941_v44  ;;  %v1092_v50 = vmul.f32 %v1028_v0, %v3008_v42  ;;  %v1094_v48 = vmul.f32 %v1030_v6, %v3033_v4  ;;  %v1103_v3 = vmul.f32 %v1039_v2, %v847_v31 }
 0x1a8   : > { %v2237_v22 = vpop.eup %2236  ;;  %v1097_v36 = vmul.f32 %v1033_v52, %v841_v17  ;;  %v1099_v29 = vmul.f32 %v1035_v10, %v843_v54  ;;  %v1088_v1 = vmul.f32 %v3070_v12, %v832_v63  ;;  %v1036_v8 = vadd.f32 1.0, %v2233_v57 }
 0x1a9   : > { %v2239_v23 = vpop.eup %2238  ;;  %v1090_v21 = vmul.f32 %v1026_v13, %v834_v58  ;;  %v1038_v30 = vadd.f32 1.0, %v2235_v34  ;;  %v1032_v42 = vadd.f32 1.0, %v2237_v22  ;;  %v844_v4 = vmul.f32 0.5, %v3027_v28  ;;  %v3140_v22 = vld [vmem:[%s3231_s4] ss:$0 sm:$0xff] }
 0x1aa   : > { %v2241_v43 = vpop.eup %2240  ;;  %v1137_v33 = vpack.c.bf16 %v1101_v16, %v1097_v36  ;;  %v1139_v27 = vpack.c.bf16 %v1103_v3, %v1099_v29  ;;  %v1132_v5 = vpack.c.bf16 %v1092_v50, %v1088_v1  ;;  %v1034_v0 = vadd.f32 1.0, %v2239_v23 }
 0x1ab   : > { %v2243_v7 = vpop.eup %2242  ;;  %v1134_v44 = vpack.c.bf16 %v1094_v48, %v1090_v21  ;;  %v846_v18 = vmul.f32 0.5, %v3036_v32  ;;  %v840_v9 = vmul.f32 0.5, %v3043_v37  ;;  %v842_v19 = vmul.f32 0.5, %v3047_v41 }
 0x1ac   : > { %v2245_v39 = vpop.eup %2244  ;;  %v1100_v26 = vmul.f32 %v1036_v8, %v844_v4  ;;  %v1041_v20 = vadd.f32 1.0, %v2243_v7  ;;  %v849_v24 = vmul.f32 0.5, %v3077_v61  ;;  %v853_v25 = vmul.f32 0.5, %v3099_v56 }
 0x1ad   : > { %v2247_v62 = vpop.eup %2246  ;;  %1480 = vmatmul.mubr.bf16.gmra.mxu0 %v1132_v5  ;;  %1577 = vmatmul.mubr.bf16.gmra.mxu1 %v1134_v44  ;;  %v1102_v45 = vmul.f32 %v1038_v30, %v846_v18  ;;  %v1043_v6 = vadd.f32 1.0, %v2245_v39  ;;  %v1096_v59 = vmul.f32 %v1032_v42, %v840_v9  ;;  %v1098_v32 = vmul.f32 %v1034_v0, %v842_v19 }
 0x1ae   : > { %v2249_v12 = vpop.eup %2248  ;;  %1487 = vmatprep.mubr.bf16.mxu0 %v1137_v33  ;;  %1584 = vmatprep.mubr.bf16.mxu1 %v1139_v27  ;;  %v851_v52 = vmul.f32 0.5, %v3080_v60  ;;  %v855_v49 = vmul.f32 0.5, %v3102_v40  ;;  %v1105_v11 = vmul.f32 %v1041_v20, %v849_v24  ;;  %v1044_v13 = vadd.f32 1.0, %v2247_v62 }
 0x1af   : > { %v2251_v46 = vpop.eup %2250  ;;  %v1136_v14 = vpack.c.bf16 %v1100_v26, %v1096_v59  ;;  %v1138_v51 = vpack.c.bf16 %v1102_v45, %v1098_v32  ;;  %v1046_v61 = vadd.f32 1.0, %v2249_v12  ;;  %v852_v2 = vmul.f32 0.5, %v3083_v55 }
 0x1b0   : > { %v2253_v28 = vpop.eup %2252  ;;  %v1045_v37 = vadd.f32 1.0, %v2251_v46  ;;  %v1107_v47 = vmul.f32 %v1043_v6, %v851_v52  ;;  %v1040_v63 = vadd.f32 1.0, %v2241_v43  ;;  %v854_v17 = vmul.f32 0.5, %v3088_v35 }
 0x1b1   : > { %v1047_v41 = vadd.f32 1.0, %v2253_v28  ;;  %v848_v40 = vmul.f32 0.5, %v3054_v38  ;;  %v850_v54 = vmul.f32 0.5, %v3093_v15  ;;  %v1108_v16 = vmul.f32 %v1044_v13, %v852_v2 }
 0x1b2   : > { %v2255_v53 = vpop.eup %2254  ;;  %v1109_v10 = vmul.f32 %v1045_v37, %v853_v25  ;;  %v1110_v34 = vmul.f32 %v1046_v61, %v854_v17 }
 0x1b3   : > { %v1111_v31 = vmul.f32 %v1047_v41, %v855_v49  ;;  %v1042_v56 = vadd.f32 1.0, %v2255_v53  ;;  %v1104_v58 = vmul.f32 %v1040_v63, %v848_v40 }
 0x1b4   : > { %v1141_v57 = vpack.c.bf16 %v1109_v10, %v1105_v11 }
 0x1b5   : > { %1488 = vmatmul.mubr.bf16.gmra.mxu0 %v1136_v14  ;;  %1585 = vmatmul.mubr.bf16.gmra.mxu1 %v1138_v51  ;;  %v1143_v60 = vpack.c.bf16 %v1111_v31, %v1107_v47  ;;  %v1106_v50 = vmul.f32 %v1042_v56, %v850_v54  ;;  %v1140_v55 = vpack.c.bf16 %v1108_v16, %v1104_v58 }
 0x1b6   : > { %1495 = vmatprep.mubr.bf16.mxu0 %v1141_v57 }
 0x1b7   : > { %1592 = vmatprep.mubr.bf16.mxu1 %v1143_v60  ;;  %v1142_v48 = vpack.c.bf16 %v1110_v34, %v1106_v50 }
 0x1bd   : > { %1496 = vmatmul.mubr.bf16.gmra.mxu0 %v1140_v55  ;;  %1593 = vmatmul.mubr.bf16.gmra.mxu1 %v1142_v48 }
 0x22f   : > { %v1844_v3 = vpop.f32.mrf.mxu0 }
 0x231   : > { %v1908_v35 = vpop.f32.mrf.mxu1  ;;  %v1845_v38 = vpop.f32.mrf.mxu0 }
 0x232   : > { %v1846_v36 = vadd.f32 %v1845_v38, %v1844_v3 }
 0x233   : > { %v1909_v15 = vpop.f32.mrf.mxu1  ;;  %v1847_v29 = vpop.f32.mrf.mxu0 }
 0x234   : > { %v1442_v23 = vadd.f32 %v1846_v36, %v3140_v22  ;;  %v1910_v1 = vadd.f32 %v1909_v15, %v1908_v35 }
 0x235   : > { %v1911_v21 = vpop.f32.mrf.mxu1  ;;  %v1848_v43 = vpop.f32.mrf.mxu0 }
 0x236   : > { %v1539_v8 = vadd.f32 %v1910_v1, %v1442_v23  ;;  %v1849_v30 = vadd.f32 %v1848_v43, %v1847_v29 }
 0x237   : > { %v1912_v33 = vpop.f32.mrf.mxu1 }
 0x238   : > { %1601 = vst [vmem:[%s3144_s15] sm:$0xff] %v1539_v8  ;;  %v1445_v27 = vadd.f32 %v1849_v30, %v3140_v22  ;;  %v1913_v7 = vadd.f32 %v1912_v33, %v1911_v21 }
 0x23a   : > { %v1542_v5 = vadd.f32 %v1913_v7, %v1445_v27 }
 0x23c   : > { %1602 = vst [vmem:[%s3144_s15 + $0x8] sm:$0xff] %v1542_v5 }
 0x240   : > { %v1850_v44 = vpop.f32.mrf.mxu0 }
 0x241   : > { %v1914_v39 = vpop.f32.mrf.mxu1 }
 0x242   : > { %v1851_v42 = vpop.f32.mrf.mxu0 }
 0x243   : > { %v1852_v0 = vadd.f32 %v1851_v42, %v1850_v44  ;;  %v1915_v4 = vpop.f32.mrf.mxu1 }
 0x244   : > { %v1853_v18 = vpop.f32.mrf.mxu0  ;;  %v1916_v9 = vadd.f32 %v1915_v4, %v1914_v39 }
 0x245   : > { %v1450_v62 = vadd.f32 %v1852_v0, %v3140_v22  ;;  %v1917_v12 = vpop.f32.mrf.mxu1 }
 0x246   : > { %v1854_v19 = vpop.f32.mrf.mxu0 }
 0x247   : > { %v1547_v26 = vadd.f32 %v1916_v9, %v1450_v62  ;;  %v1855_v45 = vadd.f32 %v1854_v19, %v1853_v18  ;;  %v1918_v20 = vpop.f32.mrf.mxu1 }
 0x248   : > { %v1919_v24 = vadd.f32 %v1918_v20, %v1917_v12 }
 0x249   : > { %1603 = vst [vmem:[%s3144_s15 + $0x10] sm:$0xff] %v1547_v26  ;;  %v1453_v46 = vadd.f32 %v1855_v45, %v3140_v22 }
 0x24b   : > { %v1550_v6 = vadd.f32 %v1919_v24, %v1453_v46 }
 0x24c   : > { %v1856_v28 = vpop.f32.mrf.mxu0 }
 0x24d   : > { %1604 = vst [vmem:[%s3144_s15 + $0x18] sm:$0xff] %v1550_v6  ;;  %v1920_v59 = vpop.f32.mrf.mxu1 }
 0x24e   : > { %v1857_v32 = vpop.f32.mrf.mxu0 }
 0x24f   : > { %v1858_v25 = vadd.f32 %v1857_v32, %v1856_v28  ;;  %v1921_v37 = vpop.f32.mrf.mxu1 }
 0x250   : > { %v1859_v52 = vpop.f32.mrf.mxu0  ;;  %v1922_v41 = vadd.f32 %v1921_v37, %v1920_v59 }
 0x251   : > { %v1458_v49 = vadd.f32 %v1858_v25, %v3140_v22  ;;  %v1923_v53 = vpop.f32.mrf.mxu1 }
 0x252   : > { %v1860_v11 = vpop.f32.mrf.mxu0 }
 0x253   : > { %v1555_v10 = vadd.f32 %v1922_v41, %v1458_v49  ;;  %v1861_v14 = vadd.f32 %v1860_v11, %v1859_v52  ;;  %v1924_v51 = vpop.f32.mrf.mxu1 }
 0x254   : > { %v1925_v13 = vadd.f32 %v1924_v51, %v1923_v53 }
 0x255   : > { %1605 = vst [vmem:[%s3144_s15 + $0x20] sm:$0xff] %v1555_v10  ;;  %v1461_v47 = vadd.f32 %v1861_v14, %v3140_v22 }
 0x257   : > { %v1558_v61 = vadd.f32 %v1925_v13, %v1461_v47 }
 0x258   : > { %v1862_v31 = vpop.f32.mrf.mxu0 }
 0x259   : > { %1606 = vst [vmem:[%s3144_s15 + $0x28] sm:$0xff] %v1558_v61 }
 0x25a   : > { %v1863_v2 = vpop.f32.mrf.mxu0 }
 0x25b   : > { %v1926_v57 = vpop.f32.mrf.mxu1  ;;  %v1864_v63 = vadd.f32 %v1863_v2, %v1862_v31 }
 0x25c   : > { %v1865_v56 = vpop.f32.mrf.mxu0 }
 0x25d   : > { %v1466_v17 = vadd.f32 %v1864_v63, %v3140_v22  ;;  %v1927_v60 = vpop.f32.mrf.mxu1 }
 0x25e   : > { %v1928_v40 = vadd.f32 %v1927_v60, %v1926_v57  ;;  %v1866_v54 = vpop.f32.mrf.mxu0 }
 0x25f   : > { %v1929_v16 = vpop.f32.mrf.mxu1  ;;  %v1867_v34 = vadd.f32 %v1866_v54, %v1865_v56 }
 0x260   : > { %v1563_v58 = vadd.f32 %v1928_v40, %v1466_v17 }
 0x261   : > { %v1469_v50 = vadd.f32 %v1867_v34, %v3140_v22  ;;  %v1930_v55 = vpop.f32.mrf.mxu1 }
 0x262   : > { %1607 = vst [vmem:[%s3144_s15 + $0x30] sm:$0xff] %v1563_v58  ;;  %v1931_v48 = vadd.f32 %v1930_v55, %v1929_v16 }
 0x264   : > { %v1566_v3 = vadd.f32 %v1931_v48, %v1469_v50 }
 0x265   : > { %v1868_v35 = vpop.f32.mrf.mxu0  ;;  %v1932_v38 = vpop.f32.mrf.mxu1 }
 0x266   : > { %1608 = vst [vmem:[%s3144_s15 + $0x38] sm:$0xff] %v1566_v3 }
 0x267   : > { %v1869_v36 = vpop.f32.mrf.mxu0  ;;  %v1933_v15 = vpop.f32.mrf.mxu1 }
 0x268   : > { %v1870_v29 = vadd.f32 %v1869_v36, %v1868_v35  ;;  %v1934_v43 = vadd.f32 %v1933_v15, %v1932_v38 }
 0x269   : > { %v1871_v23 = vpop.f32.mrf.mxu0  ;;  %v1935_v1 = vpop.f32.mrf.mxu1 }
 0x26a   : > { %v1474_v21 = vadd.f32 %v1870_v29, %v3140_v22 }
 0x26b   : > { %v1872_v8 = vpop.f32.mrf.mxu0  ;;  %v1936_v30 = vpop.f32.mrf.mxu1 }
 0x26c   : > { %v1571_v33 = vadd.f32 %v1934_v43, %v1474_v21  ;;  %v1873_v27 = vadd.f32 %v1872_v8, %v1871_v23  ;;  %v1937_v39 = vadd.f32 %v1936_v30, %v1935_v1 }
 0x26d   : > { %v1874_v7 = vpop.f32.mrf.mxu0  ;;  %v1938_v5 = vpop.f32.mrf.mxu1 }
 0x26e   : > { %1609 = vst [vmem:[%s3144_s15 + $0x40] sm:$0xff] %v1571_v33  ;;  %v1477_v44 = vadd.f32 %v1873_v27, %v3140_v22 }
 0x26f   : > { %v1875_v42 = vpop.f32.mrf.mxu0  ;;  %v1939_v0 = vpop.f32.mrf.mxu1 }
 0x270   : > { %v1574_v4 = vadd.f32 %v1937_v39, %v1477_v44  ;;  %v1876_v18 = vadd.f32 %v1875_v42, %v1874_v7  ;;  %v1940_v19 = vadd.f32 %v1939_v0, %v1938_v5 }
 0x271   : > { %v1877_v62 = vpop.f32.mrf.mxu0  ;;  %v1941_v9 = vpop.f32.mrf.mxu1 }
 0x272   : > { %1610 = vst [vmem:[%s3144_s15 + $0x48] sm:$0xff] %v1574_v4  ;;  %v1482_v12 = vadd.f32 %v1876_v18, %v3140_v22 }
 0x273   : > { %v1878_v26 = vpop.f32.mrf.mxu0  ;;  %v1942_v45 = vpop.f32.mrf.mxu1 }
 0x274   : > { %v1579_v20 = vadd.f32 %v1940_v19, %v1482_v12  ;;  %v1879_v46 = vadd.f32 %v1878_v26, %v1877_v62  ;;  %v1943_v59 = vadd.f32 %v1942_v45, %v1941_v9 }
 0x275   : > { %v1880_v24 = vpop.f32.mrf.mxu0  ;;  %v1944_v6 = vpop.f32.mrf.mxu1 }
 0x276   : > { %1611 = vst [vmem:[%s3144_s15 + $0x50] sm:$0xff] %v1579_v20  ;;  %v1485_v28 = vadd.f32 %v1879_v46, %v3140_v22 }
 0x277   : > { %v1881_v32 = vpop.f32.mrf.mxu0  ;;  %v1945_v25 = vpop.f32.mrf.mxu1 }
 0x278   : > { %v1582_v37 = vadd.f32 %v1943_v59, %v1485_v28  ;;  %v1882_v52 = vadd.f32 %v1881_v32, %v1880_v24  ;;  %v1946_v11 = vadd.f32 %v1945_v25, %v1944_v6 }
 0x279   : > { %v1883_v49 = vpop.f32.mrf.mxu0  ;;  %v1947_v41 = vpop.f32.mrf.mxu1 }
 0x27a   : > { %1612 = vst [vmem:[%s3144_s15 + $0x58] sm:$0xff] %v1582_v37  ;;  %v1490_v53 = vadd.f32 %v1882_v52, %v3140_v22 }
 0x27b   : > { %v1884_v10 = vpop.f32.mrf.mxu0  ;;  %v1948_v14 = vpop.f32.mrf.mxu1 }
 0x27c   : > { %v1587_v51 = vadd.f32 %v1946_v11, %v1490_v53  ;;  %v1885_v47 = vadd.f32 %v1884_v10, %v1883_v49  ;;  %v1949_v2 = vadd.f32 %v1948_v14, %v1947_v41 }
 0x27d   : > { %v1886_v13 = vpop.f32.mrf.mxu0  ;;  %v1950_v61 = vpop.f32.mrf.mxu1 }
 0x27e   : > { %1613 = vst [vmem:[%s3144_s15 + $0x60] sm:$0xff] %v1587_v51  ;;  %v1493_v31 = vadd.f32 %v1885_v47, %v3140_v22 }
 0x27f   : > { %v1887_v57 = vpop.f32.mrf.mxu0  ;;  %v1951_v63 = vpop.f32.mrf.mxu1 }
 0x280   : > { %v1590_v56 = vadd.f32 %v1949_v2, %v1493_v31  ;;  %v1888_v17 = vadd.f32 %v1887_v57, %v1886_v13  ;;  %v1952_v16 = vadd.f32 %v1951_v63, %v1950_v61 }
 0x281   : > { %v1889_v60 = vpop.f32.mrf.mxu0  ;;  %v1953_v40 = vpop.f32.mrf.mxu1 }
 0x282   : > { %1614 = vst [vmem:[%s3144_s15 + $0x68] sm:$0xff] %v1590_v56  ;;  %v1498_v54 = vadd.f32 %v1888_v17, %v3140_v22 }
 0x283   : > { %v1890_v34 = vpop.f32.mrf.mxu0  ;;  %v1954_v58 = vpop.f32.mrf.mxu1 }
 0x284   : > { %v1595_v50 = vadd.f32 %v1952_v16, %v1498_v54  ;;  %v1891_v55 = vadd.f32 %v1890_v34, %v1889_v60  ;;  %v1955_v3 = vadd.f32 %v1954_v58, %v1953_v40 }
 0x286   : > { %1615 = vst [vmem:[%s3144_s15 + $0x70] sm:$0xff] %v1595_v50  ;;  %v1501_v48 = vadd.f32 %v1891_v55, %v3140_v22 }
 0x288   : > { %v1598_v35 = vadd.f32 %v1955_v3, %v1501_v48 }
 0x28a   : > { %1616 = vst [vmem:[%s3144_s15 + $0x78] sm:$0xff] %v1598_v35 }
 0x28b   : > { %2375 = shalt.err (!%p2372_p9)
}
 0x28c   : > { %s2376_s8 = scalar_lea.hbm %s3181_s11, 2048  ;;  %s2380_s26 = scalar_lea.hbm %s3232_s5, 4096 }
 0x28d   : > { %p2377_p1 = scmp.ne.s32.totalorder %s3181_s11, %s2376_s8  ;;  %p2381_p11 = scmp.lt.s32.totalorder %s3181_s11, %s3232_s5 }
 0x28e   : > { %p2382_p13 = scmp.lt.s32.totalorder %s2380_s26, %s2376_s8 }
 0x28f   : > { %p2378_p8 = pnand %p2377_p1, %p3252_p6 }
 0x290   : > { %p2383_p2 = por %p2382_p13, %p2381_p11 }
 0x291   : > { %p2379_p10 = pneg %p2378_p8 }
 0x293   : > { %p2384_p4 = pnand %p2383_p2, %p2379_p10 }
 0x295   : > { %2387 = shalt.err (!%p2384_p4)
}
 0x296   : > { %s2446_s17 = smov 128   ;;  %s2447_s30 = smov 8  }
 0x297   : > { %1970 = dma.vmem_to_hbm [thread:$0]  (%p3252_p6), %s3183_s28, 2048, %s3181_s11, %s1618_s16, %s2446_s17, %s2446_s17, %s2447_s30  }
 0x298 PF: > { %s1646_s14 = sand.u32 1, %s2422_s18   ;;  %p3253_p12 = scmp.ne.s32.totalorder %s3239_s25, 0 }
 0x299   : > { %p3254_p0 = scmp.ge.s32.totalorder %s2434_s21, 2  ;;  %s1647_s9 = scalar_lea.sflag [#allocation4], %s1646_s14 }
 0x29b   : > { %p1987_p5 = pnand %p3254_p0, %p3253_p12 }
 0x29d   : > { %p1988_p3 = pneg %p1987_p5 }
 0x29f   : > { %2417 = dma.done.wait (%p1988_p3), %s1647_s9, 2048  }
 0x2a0   : > { %2419 = vsyncadd (%p1988_p3), %s1647_s9, 4294965248  ;;  %p20_p7 = scmp.ge.s32.totalorder %s2561_s6, 4   ;;  %s3255_s18 = smov %s2426_s19 }
 0x2a1   : > { %s3256_s19 = smov %s2430_s20  ;;  %s3257_s20 = smov %s2571_s10 }
 0x2a2   : > { %s3258_s21 = smov %s2561_s6  ;;  %22 = sbr.rel (!%p20_p7) target bundleno = 7 (0x7), region = 97 }
 0x2a7   :  { %1652 = vsyncpa [#allocation3], 1 }
 0x2a8   :  { %1654 = vsyncpa [#allocation3 + $0x1], 1 }
 0x2a9   :  { %1655 = vsyncpa [#allocation6], 1 }
 0x2aa   :  { %1656 = vsyncpa [#allocation9], 1 }
 0x2ab   :  { %1657 = vsyncpa [#allocation4], 1 }
 0x2ac   :  { %1659 = vsyncpa [#allocation4 + $0x1], 1 }

</bundles_post_ra>
